<compile_context>
chip_gen: v6e
topology: v6e:2x2x1
jax: 0.10.0
libtpu: 0.0.40
codegen_flags: <defaults>
</compile_context>

<pallas_src>
import numpy as np

import jax
import jax.numpy as jnp
from jax import lax
from jax.experimental import pallas as pl
from jax.experimental.pallas import tpu as pltpu


# ---------------------------------------------------------------------------
# Padded sizes / packed-layout constants
# ---------------------------------------------------------------------------
C1 = 16                 # conv1 out-channels 10 -> padded
C2 = 32                 # conv2 out-channels 20 -> padded
F1 = 64                 # fc1 out 50 -> padded
F2 = 128                # fc2 out 10 -> padded (lane-dense output)

K1 = 5 * 28             # conv1 GEMM contraction: (row-tap k1i, image col w')
H1COLS = 12 * C1        # 192: h1 columns (pooled col j1, channel c1)
W1COLS = 2 * H1COLS     # 384: pre-pool conv1 columns (d1j, j1, c1)
H2COLS = 4 * C2         # 128: h2 columns (pooled col j2, channel c2)
W2COLS = 2 * H2COLS     # 256: pre-pool conv2 columns (d2j, j2, c2)


# ---------------------------------------------------------------------------
# The single fused kernel (one grid step == one image)
# ---------------------------------------------------------------------------
def net_kernel(x1_ref, t1_ref, b1_ref, t2_ref, b2_ref,
               wf1_ref, bf1_ref, wf2_ref, bf2_ref, o_ref):
    # ---- conv1 + 2x2 max-pool + bias + relu : ONE GEMM ----
    x1 = x1_ref[0]                                                  # (24, 140) bf16
    s1 = jnp.dot(x1, t1_ref[...], preferred_element_type=jnp.float32)  # (24, 384) f32
    s1 = jnp.maximum(s1[0:12, :], s1[12:24, :])                     # pool rows (d1i)
    s1 = jnp.maximum(s1[:, 0:H1COLS], s1[:, H1COLS:2 * H1COLS])     # pool cols (d1j)
    h1 = jnp.maximum(s1 + b1_ref[...], 0.0)                         # (12, 192) f32
    # h1 rows are the pooled rows in even/odd-split order: [0,2,..,10,1,3,..,11]

    # ---- conv2 + dropout2d(identity) + 2x2 max-pool + bias + relu ----
    # 5 row-taps x {even, odd} output rows; each tap is a contiguous 4-row
    # slice of h1 thanks to the even/odd row ordering.
    s2e = None
    s2o = None
    for k in range(5):
        t2k = t2_ref[k]                                             # (192, 256) bf16
        ae, ao = k, k + 1                                           # a = d2i + k2i
        se = ae // 2 + 6 * (ae % 2)
        so = ao // 2 + 6 * (ao % 2)
        de = jnp.dot(h1[se:se + 4, :].astype(jnp.bfloat16), t2k,
                     preferred_element_type=jnp.float32)            # (4, 256)
        do = jnp.dot(h1[so:so + 4, :].astype(jnp.bfloat16), t2k,
                     preferred_element_type=jnp.float32)
        s2e = de if s2e is None else s2e + de
        s2o = do if s2o is None else s2o + do
    s2 = jnp.maximum(s2e, s2o)                                      # pool rows (d2i)
    s2 = jnp.maximum(s2[:, 0:H2COLS], s2[:, H2COLS:2 * H2COLS])     # pool cols (d2j)
    h2 = jnp.maximum(s2 + b2_ref[...], 0.0)                         # (4, 128) f32

    # ---- flatten (fc1 weight rows are pre-permuted) + fc1 + relu + dropout(id) ----
    flat = jnp.concatenate(
        [h2[0:1, :], h2[1:2, :], h2[2:3, :], h2[3:4, :]], axis=1)   # (1, 512) f32
    hid = jnp.dot(flat.astype(jnp.bfloat16), wf1_ref[...],
                  preferred_element_type=jnp.float32)               # (1, 64)
    hid = jnp.maximum(hid + bf1_ref[...], 0.0)

    # ---- fc2 + log_softmax (padded logits carry -1e30 bias => exp() == 0) ----
    logits = jnp.dot(hid.astype(jnp.bfloat16), wf2_ref[...],
                     preferred_element_type=jnp.float32) + bf2_ref[...]  # (1, 128)
    m = jnp.max(logits, axis=-1, keepdims=True)
    z = logits - m
    lse = jnp.log(jnp.sum(jnp.exp(z), axis=-1, keepdims=True))
    o_ref[0] = z - lse


# ---------------------------------------------------------------------------
# One-time weight packing (pure layout, outside the kernel)
# ---------------------------------------------------------------------------
def _pack_params(p):
    bf16, f32 = jnp.bfloat16, jnp.float32

    # conv1 -> Toeplitz matrix T1: rows (k1i, w'), cols (d1j, j1, c1)
    w1 = p["conv1_w"]                                   # (10, 1, 5, 5)
    w1f = jnp.concatenate([w1.reshape(-1), jnp.zeros((1,), w1.dtype)])
    idx1 = np.full((K1, W1COLS), w1.size, np.int32)     # default -> appended zero
    for k1i in range(5):
        for d1j in range(2):
            for j1 in range(12):
                for k1j in range(5):
                    wp = 2 * j1 + d1j + k1j             # image column, < 28
                    for c1 in range(10):
                        idx1[k1i * 28 + wp, d1j * H1COLS + j1 * C1 + c1] = \
                            (c1 * 5 + k1i) * 5 + k1j
    T1 = w1f[idx1].astype(bf16)

    # conv2 -> per-row-tap Toeplitz stack T2[k2i, (j1, c1), (d2j, j2, c2)]
    w2 = p["conv2_w"]                                   # (20, 10, 5, 5)
    w2f = jnp.concatenate([w2.reshape(-1), jnp.zeros((1,), w2.dtype)])
    idx2 = np.full((5, H1COLS, W2COLS), w2.size, np.int32)
    for k2i in range(5):
        for d2j in range(2):
            for j2 in range(4):
                for k2j in range(5):
                    j1 = 2 * j2 + d2j + k2j             # < 12
                    for c1 in range(10):
                        for c2 in range(20):
                            idx2[k2i, j1 * C1 + c1,
                                 d2j * H2COLS + j2 * C2 + c2] = \
                                ((c2 * 10 + c1) * 5 + k2i) * 5 + k2j
    T2 = w2f[idx2].astype(bf16)

    # fc1: rows permuted from PyTorch's (c2, i2, j2) flatten order to the
    # in-kernel (i2, j2, c2) order; both dims zero-padded.
    fw1 = p["fc1_w"]                                    # (50, 320)
    fw1f = jnp.concatenate([fw1.reshape(-1), jnp.zeros((1,), fw1.dtype)])
    idx3 = np.full((4 * H2COLS, F1), fw1.size, np.int32)
    for i2 in range(4):
        for j2 in range(4):
            for c2 in range(20):
                for f in range(50):
                    idx3[i2 * H2COLS + j2 * C2 + c2, f] = \
                        f * 320 + (c2 * 16 + i2 * 4 + j2)
    Wfc1 = fw1f[idx3].astype(bf16)

    # fc2: (10,50) -> transposed, zero-padded to (64, 128)
    Wfc2 = jnp.zeros((F1, F2), f32).at[:50, :10].set(p["fc2_w"].T).astype(bf16)

    # biases tiled to match the packed column orders (kept in f32)
    b1t = jnp.tile(jnp.pad(p["conv1_b"], (0, C1 - 10)), 12).reshape(1, H1COLS)
    b2t = jnp.tile(jnp.pad(p["conv2_b"], (0, C2 - 20)), 4).reshape(1, H2COLS)
    bf1 = jnp.pad(p["fc1_b"], (0, F1 - 50)).reshape(1, F1)
    bf2 = jnp.concatenate(
        [p["fc2_b"], jnp.full((F2 - 10,), -1e30, f32)]).reshape(1, F2)

    return (T1, b1t.astype(f32), T2, b2t.astype(f32),
            Wfc1, bf1.astype(f32), Wfc2, bf2.astype(f32))


# Row-gather table for the conv1 row-im2col: X1[b, d1i*12 + r1, k1i*28 + w']
#   = x[b, 2*i1 + d1i + k1i, w']   with i1 = 2*(r1 % 6) + r1 // 6
_ROW_IDX = np.zeros((24, 5), np.int32)
for _d1i in range(2):
    for _r1 in range(12):
        _i1 = 2 * (_r1 % 6) + _r1 // 6
        for _k1i in range(5):
            _ROW_IDX[_d1i * 12 + _r1, _k1i] = 2 * _i1 + _d1i + _k1i


def _pack_input(x_nchw):
    """(B,1,28,28) f32 -> (B,24,140) bf16 row-im2col in pool-friendly order."""
    B = x_nchw.shape[0]
    x_img = x_nchw.reshape(B, 28, 28)                     # Cin == 1
    rows = jnp.take(x_img, jnp.asarray(_ROW_IDX.reshape(-1)), axis=1)  # (B,120,28)
    return rows.reshape(B, 24, K1).astype(jnp.bfloat16)


# ---------------------------------------------------------------------------
# Forward pass: one fused pallas_call, grid over the batch
# ---------------------------------------------------------------------------
def net_forward(x_nchw, packed):
    B = x_nchw.shape[0]
    X1 = _pack_input(x_nchw)
    out = pl.pallas_call(
        net_kernel,
        grid=(B,),
        in_specs=[
            pl.BlockSpec((1, 24, K1), lambda b: (b, 0, 0)),           # per-image patches
            pl.BlockSpec((K1, W1COLS), lambda b: (0, 0)),             # T1
            pl.BlockSpec((1, H1COLS), lambda b: (0, 0)),              # conv1 bias (tiled)
            pl.BlockSpec((5, H1COLS, W2COLS), lambda b: (0, 0, 0)),   # T2
            pl.BlockSpec((1, H2COLS), lambda b: (0, 0)),              # conv2 bias (tiled)
            pl.BlockSpec((4 * H2COLS, F1), lambda b: (0, 0)),         # fc1 (permuted)
            pl.BlockSpec((1, F1), lambda b: (0, 0)),                  # fc1 bias
            pl.BlockSpec((F1, F2), lambda b: (0, 0)),                 # fc2
            pl.BlockSpec((1, F2), lambda b: (0, 0)),                  # fc2 bias (+ -1e30 pad)
        ],
        out_specs=pl.BlockSpec((1, 1, F2), lambda b: (b, 0, 0)),
        out_shape=jax.ShapeDtypeStruct((B, 1, F2), jnp.float32),
        compiler_params=pltpu.CompilerParams(
            dimension_semantics=("parallel",)),
    )(X1, *packed)
    return out[:, 0, :10]


# ---------------------------------------------------------------------------
# Pure-JAX reference (ground truth for the sanity check)
# ---------------------------------------------------------------------------
def net_reference(x, p):
    dn = ("NCHW", "OIHW", "NCHW")
    y = lax.conv_general_dilated(x, p["conv1_w"], (1, 1), "VALID",
                                 dimension_numbers=dn,
                                 precision=lax.Precision.HIGHEST)
    y = y + p["conv1_b"][None, :, None, None]
    y = lax.reduce_window(y, -jnp.inf, lax.max, (1, 1, 2, 2), (1, 1, 2, 2), "VALID")
    y = jnp.maximum(y, 0.0)
    y = lax.conv_general_dilated(y, p["conv2_w"], (1, 1), "VALID",
                                 dimension_numbers=dn,
                                 precision=lax.Precision.HIGHEST)
    y = y + p["conv2_b"][None, :, None, None]
    y = lax.reduce_window(y, -jnp.inf, lax.max, (1, 1, 2, 2), (1, 1, 2, 2), "VALID")
    y = jnp.maximum(y, 0.0)
    y = y.reshape(y.shape[0], 320)
    y = jnp.maximum(y @ p["fc1_w"].T + p["fc1_b"], 0.0)
    y = y @ p["fc2_w"].T + p["fc2_b"]
    return jax.nn.log_softmax(y, axis=1)


# ---------------------------------------------------------------------------
def init_params(key):
    ks = jax.random.split(key, 8)

    def u(k, shape, fan_in):
        bound = 1.0 / jnp.sqrt(fan_in)
        return jax.random.uniform(k, shape, jnp.float32, -bound, bound)

    return {
        "conv1_w": u(ks[0], (10, 1, 5, 5), 1 * 5 * 5),
        "conv1_b": u(ks[1], (10,), 1 * 5 * 5),
        "conv2_w": u(ks[2], (20, 10, 5, 5), 10 * 5 * 5),
        "conv2_b": u(ks[3], (20,), 10 * 5 * 5),
        "fc1_w":   u(ks[4], (50, 320), 320),
        "fc1_b":   u(ks[5], (50,), 320),
        "fc2_w":   u(ks[6], (10, 50), 50),
        "fc2_b":   u(ks[7], (10,), 50),
    }


if __name__ == "__main__":
    key = jax.random.PRNGKey(0)
    k_x, k_p = jax.random.split(key)
    B = 2
    # fc1 expects 320 = 20*4*4 features, which implies 28x28 single-channel input.
    x = jax.random.normal(k_x, (B, 1, 28, 28), jnp.float32)
    params = init_params(k_p)

    packed = _pack_params(params)          # one-time layout packing of the weights
    fwd = jax.jit(net_forward)
    out = jax.block_until_ready(fwd(x, packed))

    ref = jax.block_until_ready(net_reference(x, params))
    assert out.shape == (B, 10)
    assert bool(jnp.all(jnp.isfinite(out)))
    err = float(jnp.max(jnp.abs(out - ref)))
    assert err < 5e-2, f"mismatch vs reference: {err}"
    print("KERNEL_OK")
</pallas_src>

<mosaic_0001>
module attributes {stable_mosaic.version = 11 : i64} {
  func.func @net_kernel(%arg0: i32, %arg1: memref<1x24x140xbf16, #tpu.memory_space<vmem>>, %arg2: memref<140x384xbf16, #tpu.memory_space<vmem>>, %arg3: memref<1x192xf32, #tpu.memory_space<vmem>>, %arg4: memref<5x192x256xbf16, #tpu.memory_space<vmem>>, %arg5: memref<1x128xf32, #tpu.memory_space<vmem>>, %arg6: memref<512x64xbf16, #tpu.memory_space<vmem>>, %arg7: memref<1x64xf32, #tpu.memory_space<vmem>>, %arg8: memref<64x128xbf16, #tpu.memory_space<vmem>>, %arg9: memref<1x128xf32, #tpu.memory_space<vmem>>, %arg10: memref<1x1x128xf32, #tpu.memory_space<vmem>>) attributes {dimension_semantics = [#tpu.dimension_semantics<parallel>], iteration_bounds = array<i64: 2>, scalar_prefetch = 0 : i64, scratch_operands = 0 : i64, tpu.core_type = #tpu.core_type<tc>, window_params = [{transform_indices = @transform_0, window_bounds = array<i64: 1, 24, 140>}, {pipeline_mode = #tpu.pipeline_mode<synchronous>, transform_indices = @transform_1, window_bounds = array<i64: 140, 384>}, {pipeline_mode = #tpu.pipeline_mode<synchronous>, transform_indices = @transform_2, window_bounds = array<i64: 1, 192>}, {pipeline_mode = #tpu.pipeline_mode<synchronous>, transform_indices = @transform_3, window_bounds = array<i64: 5, 192, 256>}, {pipeline_mode = #tpu.pipeline_mode<synchronous>, transform_indices = @transform_4, window_bounds = array<i64: 1, 128>}, {pipeline_mode = #tpu.pipeline_mode<synchronous>, transform_indices = @transform_5, window_bounds = array<i64: 512, 64>}, {pipeline_mode = #tpu.pipeline_mode<synchronous>, transform_indices = @transform_6, window_bounds = array<i64: 1, 64>}, {pipeline_mode = #tpu.pipeline_mode<synchronous>, transform_indices = @transform_7, window_bounds = array<i64: 64, 128>}, {pipeline_mode = #tpu.pipeline_mode<synchronous>, transform_indices = @transform_8, window_bounds = array<i64: 1, 128>}, {transform_indices = @transform_9, window_bounds = array<i64: 1, 1, 128>}]} {
    %c0 = arith.constant 0 : index
    %c0_0 = arith.constant 0 : index
    %c0_1 = arith.constant 0 : index
    %0 = vector.load %arg1[%c0, %c0_0, %c0_1] : memref<1x24x140xbf16, #tpu.memory_space<vmem>>, vector<1x24x140xbf16>
    %1 = vector.shape_cast %0 : vector<1x24x140xbf16> to vector<24x140xbf16>
    %c0_2 = arith.constant 0 : index
    %c0_3 = arith.constant 0 : index
    %2 = vector.load %arg2[%c0_2, %c0_3] : memref<140x384xbf16, #tpu.memory_space<vmem>>, vector<140x384xbf16>
    %cst = arith.constant dense<0.000000e+00> : vector<24x384xf32>
    %3 = tpu.matmul %1, %2, %cst {dimension_numbers = #tpu.dot_dimension_numbers<[1], [0], [0], [1], [0, 0, 1, 1], [], []>} : vector<24x140xbf16>, vector<140x384xbf16>, vector<24x384xf32> -> vector<24x384xf32>
    %4 = vector.extract_strided_slice %3 {offsets = [0, 0], sizes = [12, 384], strides = [1, 1]} : vector<24x384xf32> to vector<12x384xf32>
    %5 = vector.extract_strided_slice %3 {offsets = [12, 0], sizes = [12, 384], strides = [1, 1]} : vector<24x384xf32> to vector<12x384xf32>
    %6 = arith.maximumf %4, %5 : vector<12x384xf32>
    %7 = vector.extract_strided_slice %6 {offsets = [0, 0], sizes = [12, 192], strides = [1, 1]} : vector<12x384xf32> to vector<12x192xf32>
    %8 = vector.extract_strided_slice %6 {offsets = [0, 192], sizes = [12, 192], strides = [1, 1]} : vector<12x384xf32> to vector<12x192xf32>
    %9 = arith.maximumf %7, %8 : vector<12x192xf32>
    %c0_4 = arith.constant 0 : index
    %c0_5 = arith.constant 0 : index
    %10 = vector.load %arg3[%c0_4, %c0_5] : memref<1x192xf32, #tpu.memory_space<vmem>>, vector<1x192xf32>
    %11 = vector.broadcast %10 : vector<1x192xf32> to vector<12x192xf32>
    %12 = arith.addf %9, %11 : vector<12x192xf32>
    %cst_6 = arith.constant 0.000000e+00 : f32
    %13 = vector.broadcast %cst_6 : f32 to vector<12x192xf32>
    %14 = arith.maximumf %12, %13 : vector<12x192xf32>
    %c0_7 = arith.constant 0 : index
    %c0_8 = arith.constant 0 : index
    %c0_9 = arith.constant 0 : index
    %15 = vector.load %arg4[%c0_7, %c0_8, %c0_9] : memref<5x192x256xbf16, #tpu.memory_space<vmem>>, vector<1x192x256xbf16>
    %16 = vector.shape_cast %15 : vector<1x192x256xbf16> to vector<192x256xbf16>
    %17 = vector.extract_strided_slice %14 {offsets = [0, 0], sizes = [4, 192], strides = [1, 1]} : vector<12x192xf32> to vector<4x192xf32>
    %18 = arith.truncf %17 : vector<4x192xf32> to vector<4x192xbf16>
    %cst_10 = arith.constant dense<0.000000e+00> : vector<4x256xf32>
    %19 = tpu.matmul %18, %16, %cst_10 {dimension_numbers = #tpu.dot_dimension_numbers<[1], [0], [0], [1], [0, 0, 1, 1], [], []>} : vector<4x192xbf16>, vector<192x256xbf16>, vector<4x256xf32> -> vector<4x256xf32>
    %20 = vector.extract_strided_slice %14 {offsets = [6, 0], sizes = [4, 192], strides = [1, 1]} : vector<12x192xf32> to vector<4x192xf32>
    %21 = arith.truncf %20 : vector<4x192xf32> to vector<4x192xbf16>
    %cst_11 = arith.constant dense<0.000000e+00> : vector<4x256xf32>
    %22 = tpu.matmul %21, %16, %cst_11 {dimension_numbers = #tpu.dot_dimension_numbers<[1], [0], [0], [1], [0, 0, 1, 1], [], []>} : vector<4x192xbf16>, vector<192x256xbf16>, vector<4x256xf32> -> vector<4x256xf32>
    %c1 = arith.constant 1 : index
    %c0_12 = arith.constant 0 : index
    %c0_13 = arith.constant 0 : index
    %23 = vector.load %arg4[%c1, %c0_12, %c0_13] : memref<5x192x256xbf16, #tpu.memory_space<vmem>>, vector<1x192x256xbf16>
    %24 = vector.shape_cast %23 : vector<1x192x256xbf16> to vector<192x256xbf16>
    %25 = vector.extract_strided_slice %14 {offsets = [6, 0], sizes = [4, 192], strides = [1, 1]} : vector<12x192xf32> to vector<4x192xf32>
    %26 = arith.truncf %25 : vector<4x192xf32> to vector<4x192xbf16>
    %cst_14 = arith.constant dense<0.000000e+00> : vector<4x256xf32>
    %27 = tpu.matmul %26, %24, %cst_14 {dimension_numbers = #tpu.dot_dimension_numbers<[1], [0], [0], [1], [0, 0, 1, 1], [], []>} : vector<4x192xbf16>, vector<192x256xbf16>, vector<4x256xf32> -> vector<4x256xf32>
    %28 = vector.extract_strided_slice %14 {offsets = [1, 0], sizes = [4, 192], strides = [1, 1]} : vector<12x192xf32> to vector<4x192xf32>
    %29 = arith.truncf %28 : vector<4x192xf32> to vector<4x192xbf16>
    %cst_15 = arith.constant dense<0.000000e+00> : vector<4x256xf32>
    %30 = tpu.matmul %29, %24, %cst_15 {dimension_numbers = #tpu.dot_dimension_numbers<[1], [0], [0], [1], [0, 0, 1, 1], [], []>} : vector<4x192xbf16>, vector<192x256xbf16>, vector<4x256xf32> -> vector<4x256xf32>
    %31 = arith.addf %19, %27 : vector<4x256xf32>
    %32 = arith.addf %22, %30 : vector<4x256xf32>
    %c2 = arith.constant 2 : index
    %c0_16 = arith.constant 0 : index
    %c0_17 = arith.constant 0 : index
    %33 = vector.load %arg4[%c2, %c0_16, %c0_17] : memref<5x192x256xbf16, #tpu.memory_space<vmem>>, vector<1x192x256xbf16>
    %34 = vector.shape_cast %33 : vector<1x192x256xbf16> to vector<192x256xbf16>
    %35 = vector.extract_strided_slice %14 {offsets = [1, 0], sizes = [4, 192], strides = [1, 1]} : vector<12x192xf32> to vector<4x192xf32>
    %36 = arith.truncf %35 : vector<4x192xf32> to vector<4x192xbf16>
    %cst_18 = arith.constant dense<0.000000e+00> : vector<4x256xf32>
    %37 = tpu.matmul %36, %34, %cst_18 {dimension_numbers = #tpu.dot_dimension_numbers<[1], [0], [0], [1], [0, 0, 1, 1], [], []>} : vector<4x192xbf16>, vector<192x256xbf16>, vector<4x256xf32> -> vector<4x256xf32>
    %38 = vector.extract_strided_slice %14 {offsets = [7, 0], sizes = [4, 192], strides = [1, 1]} : vector<12x192xf32> to vector<4x192xf32>
    %39 = arith.truncf %38 : vector<4x192xf32> to vector<4x192xbf16>
    %cst_19 = arith.constant dense<0.000000e+00> : vector<4x256xf32>
    %40 = tpu.matmul %39, %34, %cst_19 {dimension_numbers = #tpu.dot_dimension_numbers<[1], [0], [0], [1], [0, 0, 1, 1], [], []>} : vector<4x192xbf16>, vector<192x256xbf16>, vector<4x256xf32> -> vector<4x256xf32>
    %41 = arith.addf %31, %37 : vector<4x256xf32>
    %42 = arith.addf %32, %40 : vector<4x256xf32>
    %c3 = arith.constant 3 : index
    %c0_20 = arith.constant 0 : index
    %c0_21 = arith.constant 0 : index
    %43 = vector.load %arg4[%c3, %c0_20, %c0_21] : memref<5x192x256xbf16, #tpu.memory_space<vmem>>, vector<1x192x256xbf16>
    %44 = vector.shape_cast %43 : vector<1x192x256xbf16> to vector<192x256xbf16>
    %45 = vector.extract_strided_slice %14 {offsets = [7, 0], sizes = [4, 192], strides = [1, 1]} : vector<12x192xf32> to vector<4x192xf32>
    %46 = arith.truncf %45 : vector<4x192xf32> to vector<4x192xbf16>
    %cst_22 = arith.constant dense<0.000000e+00> : vector<4x256xf32>
    %47 = tpu.matmul %46, %44, %cst_22 {dimension_numbers = #tpu.dot_dimension_numbers<[1], [0], [0], [1], [0, 0, 1, 1], [], []>} : vector<4x192xbf16>, vector<192x256xbf16>, vector<4x256xf32> -> vector<4x256xf32>
    %48 = vector.extract_strided_slice %14 {offsets = [2, 0], sizes = [4, 192], strides = [1, 1]} : vector<12x192xf32> to vector<4x192xf32>
    %49 = arith.truncf %48 : vector<4x192xf32> to vector<4x192xbf16>
    %cst_23 = arith.constant dense<0.000000e+00> : vector<4x256xf32>
    %50 = tpu.matmul %49, %44, %cst_23 {dimension_numbers = #tpu.dot_dimension_numbers<[1], [0], [0], [1], [0, 0, 1, 1], [], []>} : vector<4x192xbf16>, vector<192x256xbf16>, vector<4x256xf32> -> vector<4x256xf32>
    %51 = arith.addf %41, %47 : vector<4x256xf32>
    %52 = arith.addf %42, %50 : vector<4x256xf32>
    %c4 = arith.constant 4 : index
    %c0_24 = arith.constant 0 : index
    %c0_25 = arith.constant 0 : index
    %53 = vector.load %arg4[%c4, %c0_24, %c0_25] : memref<5x192x256xbf16, #tpu.memory_space<vmem>>, vector<1x192x256xbf16>
    %54 = vector.shape_cast %53 : vector<1x192x256xbf16> to vector<192x256xbf16>
    %55 = vector.extract_strided_slice %14 {offsets = [2, 0], sizes = [4, 192], strides = [1, 1]} : vector<12x192xf32> to vector<4x192xf32>
    %56 = arith.truncf %55 : vector<4x192xf32> to vector<4x192xbf16>
    %cst_26 = arith.constant dense<0.000000e+00> : vector<4x256xf32>
    %57 = tpu.matmul %56, %54, %cst_26 {dimension_numbers = #tpu.dot_dimension_numbers<[1], [0], [0], [1], [0, 0, 1, 1], [], []>} : vector<4x192xbf16>, vector<192x256xbf16>, vector<4x256xf32> -> vector<4x256xf32>
    %58 = vector.extract_strided_slice %14 {offsets = [8, 0], sizes = [4, 192], strides = [1, 1]} : vector<12x192xf32> to vector<4x192xf32>
    %59 = arith.truncf %58 : vector<4x192xf32> to vector<4x192xbf16>
    %cst_27 = arith.constant dense<0.000000e+00> : vector<4x256xf32>
    %60 = tpu.matmul %59, %54, %cst_27 {dimension_numbers = #tpu.dot_dimension_numbers<[1], [0], [0], [1], [0, 0, 1, 1], [], []>} : vector<4x192xbf16>, vector<192x256xbf16>, vector<4x256xf32> -> vector<4x256xf32>
    %61 = arith.addf %51, %57 : vector<4x256xf32>
    %62 = arith.addf %52, %60 : vector<4x256xf32>
    %63 = arith.maximumf %61, %62 : vector<4x256xf32>
    %64 = vector.extract_strided_slice %63 {offsets = [0, 0], sizes = [4, 128], strides = [1, 1]} : vector<4x256xf32> to vector<4x128xf32>
    %65 = vector.extract_strided_slice %63 {offsets = [0, 128], sizes = [4, 128], strides = [1, 1]} : vector<4x256xf32> to vector<4x128xf32>
    %66 = arith.maximumf %64, %65 : vector<4x128xf32>
    %c0_28 = arith.constant 0 : index
    %c0_29 = arith.constant 0 : index
    %67 = vector.load %arg5[%c0_28, %c0_29] : memref<1x128xf32, #tpu.memory_space<vmem>>, vector<1x128xf32>
    %68 = vector.broadcast %67 : vector<1x128xf32> to vector<4x128xf32>
    %69 = arith.addf %66, %68 : vector<4x128xf32>
    %cst_30 = arith.constant 0.000000e+00 : f32
    %70 = vector.broadcast %cst_30 : f32 to vector<4x128xf32>
    %71 = arith.maximumf %69, %70 : vector<4x128xf32>
    %72 = vector.extract_strided_slice %71 {offsets = [0, 0], sizes = [1, 128], strides = [1, 1]} : vector<4x128xf32> to vector<1x128xf32>
    %73 = vector.extract_strided_slice %71 {offsets = [1, 0], sizes = [1, 128], strides = [1, 1]} : vector<4x128xf32> to vector<1x128xf32>
    %74 = vector.extract_strided_slice %71 {offsets = [2, 0], sizes = [1, 128], strides = [1, 1]} : vector<4x128xf32> to vector<1x128xf32>
    %75 = vector.extract_strided_slice %71 {offsets = [3, 0], sizes = [1, 128], strides = [1, 1]} : vector<4x128xf32> to vector<1x128xf32>
    %76 = tpu.concatenate %72, %73, %74, %75 in 1 : vector<1x128xf32>, vector<1x128xf32>, vector<1x128xf32>, vector<1x128xf32> -> vector<1x512xf32>
    %77 = arith.truncf %76 : vector<1x512xf32> to vector<1x512xbf16>
    %c0_31 = arith.constant 0 : index
    %c0_32 = arith.constant 0 : index
    %78 = vector.load %arg6[%c0_31, %c0_32] : memref<512x64xbf16, #tpu.memory_space<vmem>>, vector<512x64xbf16>
    %cst_33 = arith.constant dense<0.000000e+00> : vector<1x64xf32>
    %79 = tpu.matmul %77, %78, %cst_33 {dimension_numbers = #tpu.dot_dimension_numbers<[1], [0], [0], [1], [0, 0, 1, 1], [], []>} : vector<1x512xbf16>, vector<512x64xbf16>, vector<1x64xf32> -> vector<1x64xf32>
    %c0_34 = arith.constant 0 : index
    %c0_35 = arith.constant 0 : index
    %80 = vector.load %arg7[%c0_34, %c0_35] : memref<1x64xf32, #tpu.memory_space<vmem>>, vector<1x64xf32>
    %81 = arith.addf %79, %80 : vector<1x64xf32>
    %cst_36 = arith.constant 0.000000e+00 : f32
    %82 = vector.broadcast %cst_36 : f32 to vector<1x64xf32>
    %83 = arith.maximumf %81, %82 : vector<1x64xf32>
    %84 = arith.truncf %83 : vector<1x64xf32> to vector<1x64xbf16>
    %c0_37 = arith.constant 0 : index
    %c0_38 = arith.constant 0 : index
    %85 = vector.load %arg8[%c0_37, %c0_38] : memref<64x128xbf16, #tpu.memory_space<vmem>>, vector<64x128xbf16>
    %cst_39 = arith.constant dense<0.000000e+00> : vector<1x128xf32>
    %86 = tpu.matmul %84, %85, %cst_39 {dimension_numbers = #tpu.dot_dimension_numbers<[1], [0], [0], [1], [0, 0, 1, 1], [], []>} : vector<1x64xbf16>, vector<64x128xbf16>, vector<1x128xf32> -> vector<1x128xf32>
    %c0_40 = arith.constant 0 : index
    %c0_41 = arith.constant 0 : index
    %87 = vector.load %arg9[%c0_40, %c0_41] : memref<1x128xf32, #tpu.memory_space<vmem>>, vector<1x128xf32>
    %88 = arith.addf %86, %87 : vector<1x128xf32>
    %cst_42 = arith.constant dense<0xFF800000> : vector<1xf32>
    %89 = vector.multi_reduction <maximumf>, %88, %cst_42 [1] : vector<1x128xf32> to vector<1xf32>
    %90 = vector.shape_cast %89 : vector<1xf32> to vector<1x1xf32>
    %91 = vector.broadcast %90 : vector<1x1xf32> to vector<1x128xf32>
    %92 = arith.subf %88, %91 : vector<1x128xf32>
    %93 = math.exp %92 : vector<1x128xf32>
    %cst_43 = arith.constant dense<0.000000e+00> : vector<1xf32>
    %94 = vector.multi_reduction <add>, %93, %cst_43 [1] : vector<1x128xf32> to vector<1xf32>
    %95 = vector.shape_cast %94 : vector<1xf32> to vector<1x1xf32>
    %96 = math.log %95 : vector<1x1xf32>
    %97 = vector.broadcast %96 : vector<1x1xf32> to vector<1x128xf32>
    %98 = arith.subf %92, %97 : vector<1x128xf32>
    %c0_44 = arith.constant 0 : index
    %c0_45 = arith.constant 0 : index
    %c0_46 = arith.constant 0 : index
    %99 = vector.load %arg10[%c0_44, %c0_45, %c0_46] : memref<1x1x128xf32, #tpu.memory_space<vmem>>, vector<1x1x128xf32>
    %100 = vector.shape_cast %99 : vector<1x1x128xf32> to vector<1x128xf32>
    %101 = vector.shape_cast %98 : vector<1x128xf32> to vector<1x1x128xf32>
    tpu.vector_store %arg10[%c0_44, %c0_45, %c0_46], %101 {strides = array<i32>} : memref<1x1x128xf32, #tpu.memory_space<vmem>>, vector<1x1x128xf32>,
    return
  }
  func.func @transform_0(%arg0: i32) -> (i32, i32, i32) {
    %c0_i32 = arith.constant 0 : i32
    %c0_i32_0 = arith.constant 0 : i32
    %c0_i32_1 = arith.constant 0 : i32
    return %arg0, %c0_i32, %c0_i32_0 : i32, i32, i32
  }
  func.func @transform_1(%arg0: i32) -> (i32, i32) {
    %c0_i32 = arith.constant 0 : i32
    %c0_i32_0 = arith.constant 0 : i32
    %c0_i32_1 = arith.constant 0 : i32
    return %c0_i32, %c0_i32_0 : i32, i32
  }
  func.func @transform_2(%arg0: i32) -> (i32, i32) {
    %c0_i32 = arith.constant 0 : i32
    %c0_i32_0 = arith.constant 0 : i32
    %c0_i32_1 = arith.constant 0 : i32
    return %c0_i32, %c0_i32_0 : i32, i32
  }
  func.func @transform_3(%arg0: i32) -> (i32, i32, i32) {
    %c0_i32 = arith.constant 0 : i32
    %c0_i32_0 = arith.constant 0 : i32
    %c0_i32_1 = arith.constant 0 : i32
    %c0_i32_2 = arith.constant 0 : i32
    return %c0_i32, %c0_i32_0, %c0_i32_1 : i32, i32, i32
  }
  func.func @transform_4(%arg0: i32) -> (i32, i32) {
    %c0_i32 = arith.constant 0 : i32
    %c0_i32_0 = arith.constant 0 : i32
    %c0_i32_1 = arith.constant 0 : i32
    return %c0_i32, %c0_i32_0 : i32, i32
  }
  func.func @transform_5(%arg0: i32) -> (i32, i32) {
    %c0_i32 = arith.constant 0 : i32
    %c0_i32_0 = arith.constant 0 : i32
    %c0_i32_1 = arith.constant 0 : i32
    return %c0_i32, %c0_i32_0 : i32, i32
  }
  func.func @transform_6(%arg0: i32) -> (i32, i32) {
    %c0_i32 = arith.constant 0 : i32
    %c0_i32_0 = arith.constant 0 : i32
    %c0_i32_1 = arith.constant 0 : i32
    return %c0_i32, %c0_i32_0 : i32, i32
  }
  func.func @transform_7(%arg0: i32) -> (i32, i32) {
    %c0_i32 = arith.constant 0 : i32
    %c0_i32_0 = arith.constant 0 : i32
    %c0_i32_1 = arith.constant 0 : i32
    return %c0_i32, %c0_i32_0 : i32, i32
  }
  func.func @transform_8(%arg0: i32) -> (i32, i32) {
    %c0_i32 = arith.constant 0 : i32
    %c0_i32_0 = arith.constant 0 : i32
    %c0_i32_1 = arith.constant 0 : i32
    return %c0_i32, %c0_i32_0 : i32, i32
  }
  func.func @transform_9(%arg0: i32) -> (i32, i32, i32) {
    %c0_i32 = arith.constant 0 : i32
    %c0_i32_0 = arith.constant 0 : i32
    %c0_i32_1 = arith.constant 0 : i32
    return %arg0, %c0_i32, %c0_i32_0 : i32, i32, i32
  }
}

</mosaic_0001>

<bundles_post_ra>
// kernel: net_forward.1
= control target key start
LH: loop header
LB: loop body
LE: loop exit
PB: predicated region body
PF: predicated region fallthrough
CT: control target
= control target key end

     0   :  { %14 = vsyncpa [#allocation3], 0  ;;  %s3997_s0 = inlined_call_operand.vmem [shape: bf16[2,24,140], index: 0, kind: input, shape index: {}]   ;;  %s3998_s1 = inlined_call_operand.hbm [shape: bf16[140,384], index: 1, kind: input, shape index: {}]   ;;  %s3999_s2 = inlined_call_operand.vmem [shape: f32[1,192], index: 2, kind: input, shape index: {}]   ;;  %s4000_s3 = inlined_call_operand.vmem [shape: bf16[5,192,256], index: 3, kind: input, shape index: {}]   ;;  %s4001_s4 = inlined_call_operand.vmem [shape: f32[1,128], index: 4, kind: input, shape index: {}]   ;;  %s4002_s5 = inlined_call_operand.vmem [shape: bf16[512,64], index: 5, kind: input, shape index: {}]   ;;  %s4003_s6 = inlined_call_operand.vmem [shape: f32[1,64], index: 6, kind: input, shape index: {}]   ;;  %s4004_s7 = inlined_call_operand.vmem [shape: bf16[64,128], index: 7, kind: input, shape index: {}]   ;;  %s4005_s8 = inlined_call_operand.vmem [shape: f32[1,128], index: 8, kind: input, shape index: {}]   ;;  %s4006_s9 = inlined_call_operand.hbm [shape: f32[2,1,128], index: 9, kind: output, shape index: {}]  }
   0x1   :  { %15 = vsyncpa [#allocation4], 0 }
   0x2   :  { %17 = vsyncpa [#allocation4 + $0x1], 0  ;;  %s3310_s30 = smov 0   ;;  %s3312_s10 = smov 0  }
   0x3   :  { %s3314_s11 = smov 0   ;;  %s3316_s12 = smov 0  }
   0x4 LB: > { %s3331_s13 = sadd.s32 4294967295, %s3250_s12   ;;  %s2471_s14 = sadd.s32 4294967294, %s3250_s12   ;;  %s3250_s12 = sphi %s3316_s12, %s4014_s12   ;;  %s3246_s11 = sphi %s3314_s11, %s4013_s11   ;;  %s3242_s10 = sphi %s3312_s10, %s4012_s10   ;;  %s3238_s30 = sphi %s3310_s30, %s4011_s30  }
   0x5   : > { %s3335_s15 = sadd.s32 1, %s3250_s12   ;;  %s224_s16 = sadd.s32 1, %s3246_s11 }
   0x6   : > { %s221_s17 = ssub.s32 %s3250_s12, %s3335_s15  ;;  %p234_p0 = scmp.ne.s32.totalorder %s3246_s11, %s3242_s10 }
   0x7   : > { %p222_p1 = scmp.eq.s32.totalorder %s221_s17, 0  ;;  %p235_p2 = scmp.eq.s32.totalorder %s3331_s13, 1 }
   0x8   : > { %p240_p3 = scmp.ne.s32.totalorder %s3242_s10, %s3238_s30  ;;  %p241_p4 = scmp.eq.s32.totalorder %s2471_s14, 1 }
   0x9   : > { %s3346_s18 = scalar_select %p222_p1, %s3246_s11, %s224_s16  }
   0xa   : > { %p3348_p5 = por %p235_p2, %p234_p0  ;;  %p3352_p6 = por %p241_p4, %p240_p3 }
   0xb   : > { %p2472_p7 = scmp.ge.s32.totalorder %s3250_s12, 1  ;;  %p248_p8 = scmp.lt.s32.totalorder %s3250_s12, 3 }
   0xc   : > { %s4008_s20 = scalar_select %p3352_p6, 1, 0 }
   0xd   : > { %p2857_p9 = scmp.eq.s32.totalorder %s3331_s13, 0  ;;  %p3359_p10 = pnand %p2472_p7, %p248_p8 }
   0xe   : > { %s3252_s22 = smov [#allocation2]  }
   0xf   : > { %s260_s23 = sshll.u32 %s3252_s22, 4  ;;  %p2849_p11 = pneg %p3359_p10  ;;  %s261_s23 = int_to_ptr.vmem [resolvable:$true] %s260_s23 }
  0x10   : > { %s3171_s24 = scalar_lea.vmem %s261_s23, 3456  ;;  %p3179_p3 = scmp.lt.s32.totalorder %s261_s23, %s261_s23 }
  0x11   : > { %p2850_p12 = pnand %p2857_p9, %p2849_p11  ;;  %p3172_p0 = scmp.ne.s32.totalorder %s261_s23, %s3171_s24 }
  0x12   : > { %p3180_p4 = scmp.lt.s32.totalorder %s3171_s24, %s3171_s24 }
  0x13   : > { %p3162_p13 = pneg %p2850_p12 }
  0x14   : > { %p3181_p6 = por %p3180_p4, %p3179_p3 }
  0x15   : > { %p3174_p1 = pnand %p3172_p0, %p3162_p13 }
  0x17   : > { %p3175_p2 = pneg %p3174_p1 }
  0x19   : > { %p3182_p7 = pnand %p3181_p6, %p3175_p2 }
  0x1b   : > { %3185 = shalt.err (!%p3182_p7)
}
  0x1c   : > { %s3253_s25 = smov 192   ;;  %s3254_s26 = smov 12  }
  0x1d   : > { %2852 = dma.hbm_to_vmem [thread:$0]  (!%p2850_p12), %s3998_s1, 3456, %s261_s23, [#allocation3], %s3253_s25, %s3253_s25, %s3254_s26  }
  0x1e   : > { %305 = sbr.rel (%p3359_p10) target bundleno = 1544 (0x608), region = 56 }
  0x23   : > { %3229 = dma.done.wait (%p2857_p9), [#allocation3], 3456  }
  0x24   : > { %3231 = vsyncadd (%p2857_p9), [#allocation3], 4294963840  ;;  %v3255_v0 = vmov 0   ;;  %v2899_v1 = vld [vmem:[#allocation2 + $0xac] ss:$12 sps:$4 sm:$0xff]   ;;  %p340_p6 = scmp.lt.s32.totalorder %s3331_s13, 1 }
  0x25   : > { %609 = vmatprep.subr.bf16.mxu1 %v3255_v0  ;;  %v2901_v2 = vld [vmem:[#allocation2 + $0xb0] ss:$12 sps:$4 sm:$0xff]   ;;  %558 = vmatprep.subr.bf16.mxu0 %v2899_v1  ;;  %v2902_v3 = vld [vmem:[#allocation2 + $0xa8] ss:$12 sps:$4 sm:$0xff]   ;;  %v2905_v5 = vld [vmem:[#allocation2 + $0x98] ss:$12 sps:$4 sm:$0xff]  }
  0x26   : > { %610 = vmatpush1.bf16.msra.mxu1 %v2901_v2  ;;  %v2903_v4 = vld [vmem:[#allocation2 + $0x94] ss:$12 sps:$4 sm:$0xff]   ;;  %559 = vmatpush1.bf16.msra.mxu0 %v2902_v3  ;;  %v2906_v6 = vld [vmem:[#allocation2 + $0x90] ss:$12 sps:$4 sm:$0xff]   ;;  %v2910_v9 = vld [vmem:[#allocation2 + $0x78] ss:$12 sps:$4 sm:$0xff]  }
  0x27   : > { %611 = vmatprep.subr.bf16.mxu1 %v3255_v0  ;;  %560 = vmatprep.subr.bf16.mxu0 %v2903_v4  ;;  %v2907_v7 = vld [vmem:[#allocation2 + $0x7c] ss:$12 sps:$4 sm:$0xff]   ;;  %v2909_v8 = vld [vmem:[#allocation2 + $0x80] ss:$12 sps:$4 sm:$0xff]   ;;  %v2911_v10 = vld [vmem:[#allocation2 + $0x64] ss:$12 sps:$4 sm:$0xff]  }
  0x28   : > { %s341_s29 = scalar_select %p340_p6, %s3331_s13, 1  ;;  %v2913_v11 = vld [vmem:[#allocation2 + $0x68] ss:$12 sps:$4 sm:$0xff]   ;;  %v2914_v12 = vld [vmem:[#allocation2 + $0x60] ss:$12 sps:$4 sm:$0xff]   ;;  %vm541_vm0 = vcmask 97280  }
  0x29   : > { %v2915_v13 = vld [vmem:[#allocation2 + $0x4c] ss:$12 sps:$4 sm:$0xff]   ;;  %v2917_v14 = vld [vmem:[#allocation2 + $0x50] ss:$12 sps:$4 sm:$0xff]   ;;  %v2918_v15 = vld [vmem:[#allocation2 + $0x48] ss:$12 sps:$4 sm:$0xff]  }
  0x2a   : > { %612 = vmatpush1.bf16.msra.mxu1 %v2905_v5  ;;  %561 = vmatpush1.bf16.msra.mxu0 %v2906_v6  ;;  %s2842_s14 = smul.u32 24, %s341_s29  ;;  %v2919_v16 = vld [vmem:[#allocation2 + $0x34] ss:$12 sps:$4 sm:$0xff]   ;;  %v2921_v17 = vld [vmem:[#allocation2 + $0x38] ss:$12 sps:$4 sm:$0xff]   ;;  %vm548_vm1 = vcmask 1045504  }
  0x2b   : > { %613 = vmatprep.subr.bf16.mxu1 %v3255_v0  ;;  %562 = vmatprep.subr.bf16.mxu0 %v2907_v7  ;;  %v2922_v18 = vld [vmem:[#allocation2 + $0x30] ss:$12 sps:$4 sm:$0xff]   ;;  %v2925_v20 = vld [vmem:[#allocation2 + $0x20] ss:$12 sps:$4 sm:$0xff]   ;;  %v2926_v21 = vld [vmem:[#allocation2 + $0x18] ss:$12 sps:$4 sm:$0xff]  }
  0x2c   : > { %s3386_s21 = scalar_lea.vmem %s3997_s0, %s2842_s14  ;;  %v2923_v19 = vld [vmem:[#allocation2 + $0x1c] ss:$12 sps:$4 sm:$0xff]   ;;  %v2927_v23 = vld [vmem:[#allocation2 + $0x4] ss:$12 sps:$4 sm:$0xff]   ;;  %v2930_v25 = vld [vmem:[#allocation2] ss:$12 sps:$4 sm:$0xff]  }
  0x2d   : > { %v2937_v22 = vld [vmem:[%s3386_s21 + $0x4] ss:$8 sps:$4 sm:$0xff]   ;;  %v2929_v24 = vld [vmem:[#allocation2 + $0x8] ss:$12 sps:$4 sm:$0xff]   ;;  %v2940_v35 = vld [vmem:[%s4000_s3 + $0x130] ss:$8 sps:$4 sm:$0xff]  }
  0x2e   : > { %614 = vmatpush1.bf16.msra.mxu1 %v2909_v8  ;;  %563 = vmatpush1.bf16.msra.mxu0 %v2910_v9  ;;  %v2933_v26 = vld [vmem:[#allocation2 + $0xc8] ss:$12 sps:$4 sm:$0x3f]   ;;  %v2931_v27 = vld [vmem:[#allocation2 + $0xc4] ss:$12 sps:$4 sm:$0x3f]  }
  0x2f   : > { %615 = vmatprep.subr.bf16.mxu1 %v3255_v0  ;;  %564 = vmatprep.subr.bf16.mxu0 %v2911_v10  ;;  %v2934_v28 = vld [vmem:[#allocation2 + $0xc0] ss:$12 sps:$4 sm:$0x3f]   ;;  %v348_v29 = vld [vmem:[%s3386_s21 + $0x10] sm:$0xff]  ;;  %v556_v30 = vsel %vm548_vm1, %v2933_v26, 0  ;;  %vm663_vm2 = vcmask 1043456  }
  0x30   : > { %2512 = vmatprep.mubr.msk.bf16.mxu1 %vm541_vm0, %v2937_v22  ;;  %2510 = vmatprep.mubr.msk.bf16.mxu0 %vm541_vm0, %v2937_v22  ;;  %v2935_v31 = vld [vmem:[%s3386_s21] ss:$8 sps:$4 sm:$0xff]   ;;  %v550_v32 = vsel %vm548_vm1, %v2934_v28, 0  ;;  %v2481_v33 = vcombine.high %v348_v29, %v348_v29  ;;  %v2480_v34 = vcombine.low %v348_v29, %v348_v29  ;;  %v2942_v36 = vld [vmem:[%s4000_s3 + $0x134] ss:$8 sps:$4 sm:$0xff]   ;;  %s3256_s22 = smov 64  }
  0x31   : > { %v2945_v37 = vld [vmem:[%s4000_s3 + $0x124] ss:$8 sps:$4 sm:$0xff]   ;;  %v2943_v38 = vld [vmem:[%s4000_s3 + $0x120] ss:$8 sps:$4 sm:$0xff]   ;;  %v2948_v39 = vld [vmem:[%s4000_s3 + $0x114] ss:$8 sps:$4 sm:$0xff]  }
  0x32   : > { %616 = vmatpush1.bf16.msra.mxu1 %v2913_v11  ;;  %565 = vmatpush1.bf16.msra.mxu0 %v2914_v12  ;;  %v2946_v40 = vld [vmem:[%s4000_s3 + $0x110] ss:$8 sps:$4 sm:$0xff]   ;;  %v2951_v41 = vld [vmem:[%s4000_s3 + $0x104] ss:$8 sps:$4 sm:$0xff]   ;;  %v2949_v42 = vld [vmem:[%s4000_s3 + $0x100] ss:$8 sps:$4 sm:$0xff]  }
  0x33   : > { %617 = vmatprep.subr.bf16.mxu1 %v3255_v0  ;;  %566 = vmatprep.subr.bf16.mxu0 %v2915_v13  ;;  %v2954_v43 = vld [vmem:[%s4000_s3 + $0xf4] ss:$8 sps:$4 sm:$0xff]   ;;  %v2952_v44 = vld [vmem:[%s4000_s3 + $0xf0] ss:$8 sps:$4 sm:$0xff]   ;;  %v2957_v45 = vld [vmem:[%s4000_s3 + $0xe4] ss:$8 sps:$4 sm:$0xff]  }
  0x34   : > { %v2955_v46 = vld [vmem:[%s4000_s3 + $0xe0] ss:$8 sps:$4 sm:$0xff]   ;;  %v2960_v47 = vld [vmem:[%s4000_s3 + $0xd4] ss:$8 sps:$4 sm:$0xff]   ;;  %v2958_v48 = vld [vmem:[%s4000_s3 + $0xd0] ss:$8 sps:$4 sm:$0xff]  }
  0x35   : > { %v2963_v49 = vld [vmem:[%s4000_s3 + $0xc4] ss:$8 sps:$4 sm:$0xff]   ;;  %v2961_v50 = vld [vmem:[%s4000_s3 + $0xc0] ss:$8 sps:$4 sm:$0xff]   ;;  %v2966_v51 = vld [vmem:[%s4000_s3 + $0x174] ss:$8 sps:$4 sm:$0xff]  }
  0x36   : > { %618 = vmatpush1.bf16.msra.mxu1 %v2917_v14  ;;  %567 = vmatpush1.bf16.msra.mxu0 %v2918_v15  ;;  %v2964_v52 = vld [vmem:[%s4000_s3 + $0x170] ss:$8 sps:$4 sm:$0xff]   ;;  %v2967_v57 = vld [vmem:[%s4000_s3 + $0x160] ss:$8 sps:$4 sm:$0xff]   ;;  %v2969_v58 = vld [vmem:[%s4000_s3 + $0x164] ss:$8 sps:$4 sm:$0xff]  }
  0x37   : > { %619 = vmatprep.subr.bf16.mxu1 %v3255_v0  ;;  %568 = vmatprep.subr.bf16.mxu0 %v2919_v16  ;;  %v2970_v2 = vld [vmem:[%s4000_s3 + $0x150] ss:$8 sps:$4 sm:$0xff]   ;;  %v2975_v14 = vld [vmem:[%s4000_s3 + $0x144] ss:$8 sps:$4 sm:$0xff]   ;;  %vm697_vm3 = vcmask 523264   ;;  %vm3258_vm4 = vmmov 0  }
  0x38   : > { %vm2377_vm5 = vcmask 1040384   ;;  %s338_s16 = sand.u32 1, %s3242_s10   ;;  %s2778_s17 = sshll.u32 %s3331_s13, 4 }
  0x39   : > { %s339_s21 = scalar_lea.vmem [#allocation5], %s338_s16  ;;  %s2402_s25 = scalar_lea.hbm %s4006_s9, %s2778_s17 }
  0x3a   : > { %620 = vmatpush1.bf16.msra.mxu1 %v2921_v17  ;;  %569 = vmatpush1.bf16.msra.mxu0 %v2922_v18  ;;  %v2973_v17 = vld [vmem:[%s4000_s3 + $0x140] ss:$8 sps:$4 sm:$0xff]   ;;  %s2392_s26 = scalar_lea.sflag [#allocation4], %s338_s16  ;;  %s3259_s28 = smov [#allocation5]  }
  0x3b   : > { %621 = vmatprep.subr.bf16.mxu1 %v3255_v0  ;;  %570 = vmatprep.subr.bf16.mxu0 %v2923_v19  ;;  %s3190_s29 = sshll.u32 %s3259_s28, 4  ;;  %s3191_s29 = int_to_ptr.vmem [resolvable:$false] %s3190_s29 }
  0x3c   : > { %s3192_s13 = scalar_lea.vmem %s3191_s29, 32 }
  0x3e   : > { %622 = vmatpush1.bf16.msra.mxu1 %v2925_v20  ;;  %571 = vmatpush1.bf16.msra.mxu0 %v2926_v21 }
  0x3f   : > { %623 = vmatprep.subr.bf16.mxu1 %v3255_v0  ;;  %572 = vmatprep.subr.bf16.mxu0 %v2927_v23 }
  0x42   : > { %624 = vmatpush1.bf16.msra.mxu1 %v2929_v24  ;;  %573 = vmatpush1.bf16.msra.mxu0 %v2930_v25  ;;  %v2978_v24 = vld [vmem:[%s4000_s3 + $0x74] ss:$8 sps:$4 sm:$0xff]  }
  0x43   : > { %639 = vmatprep.subr.bf16.mxu1 %v3255_v0  ;;  %2509 = vmatprep.subr.msk.bf16.mxu0 %vm548_vm1, %v2931_v27  ;;  %v2972_v0 = vld [vmem:[%s4000_s3 + $0x154] ss:$8 sps:$4 sm:$0xff]   ;;  %v710_v27 = vlaneseq }
  0x45   : > { %v711_v28 = vshrl.u32 %v710_v27, 7 }
  0x46   : > { %640 = vmatpush2.bf16.msra.mxu1 %v556_v30  ;;  %589 = vmatpush2.bf16.msra.mxu0 %v550_v32 }
  0x47   : > { %909 = vmatprep.subr.bf16.mxu0 %v2942_v36  ;;  %968 = vmatprep.subr.bf16.mxu1 %v2942_v36  ;;  %v716_v29 = vsub.s32 1, %v711_v28  ;;  %v712_v32 = vsub.s32 0, %v711_v28  ;;  %v3012_v28 = vld [vmem:[%s4000_s3 + $0x1f0] ss:$8 sps:$4 sm:$0xff]  }
  0x49   : > { %642 = vmatmul.mubr.bf16.vlgmr.msra.gmra.mxu1 %v2935_v31  ;;  %591 = vmatmul.mubr.bf16.vlgmr.msra.gmra.mxu0 %v2935_v31  ;;  %v708_v31 = vld [vmem:[%s3999_s2] sm:$0x3] }
  0x4a   : > { %2513 = vmatprep.mubr.msk.bf16.mxu1 %vm541_vm0, %v2481_v33  ;;  %2511 = vmatprep.mubr.msk.bf16.mxu0 %vm541_vm0, %v2481_v33 }
  0x4b   : > { %910 = vmatpush1.bf16.msra.mxu0 %v2940_v35  ;;  %969 = vmatpush1.bf16.msra.mxu1 %v2940_v35  ;;  %v713_v35 = vrot.slane %v708_v31, %v712_v32  ;;  %v3015_v32 = vld [vmem:[%s4000_s3 + $0x1e0] ss:$8 sps:$4 sm:$0xff]  }
  0x4c   : > { %911 = vmatprep.subr.bf16.mxu0 %v2945_v37  ;;  %970 = vmatprep.subr.bf16.mxu1 %v2945_v37 }
  0x4f   : > { %912 = vmatpush1.bf16.msra.mxu0 %v2943_v38  ;;  %971 = vmatpush1.bf16.msra.mxu1 %v2943_v38 }
  0x50   : > { %913 = vmatprep.subr.bf16.mxu0 %v2948_v39  ;;  %972 = vmatprep.subr.bf16.mxu1 %v2948_v39 }
  0x51   : > { %650 = vmatmul.mubr.bf16.gmra.mxu1 %v2480_v34  ;;  %601 = vmatmul.mubr.bf16.gmra.mxu0 %v2480_v34  ;;  %v717_v34 = vrot.slane %v708_v31, %v716_v29  ;;  %v3017_v29 = vld [vmem:[%s4000_s3 + $0x1e4] ss:$8 sps:$4 sm:$0xff]  }
  0x53   : > { %914 = vmatpush1.bf16.msra.mxu0 %v2946_v40  ;;  %973 = vmatpush1.bf16.msra.mxu1 %v2946_v40 }
  0x54   : > { %915 = vmatprep.subr.bf16.mxu0 %v2951_v41  ;;  %974 = vmatprep.subr.bf16.mxu1 %v2951_v41 }
  0x57   : > { %916 = vmatpush1.bf16.msra.mxu0 %v2949_v42  ;;  %975 = vmatpush1.bf16.msra.mxu1 %v2949_v42 }
  0x58   : > { %917 = vmatprep.subr.bf16.mxu0 %v2954_v43  ;;  %976 = vmatprep.subr.bf16.mxu1 %v2954_v43 }
  0x5b   : > { %918 = vmatpush1.bf16.msra.mxu0 %v2952_v44  ;;  %977 = vmatpush1.bf16.msra.mxu1 %v2952_v44 }
  0x5c   : > { %919 = vmatprep.subr.bf16.mxu0 %v2957_v45  ;;  %978 = vmatprep.subr.bf16.mxu1 %v2957_v45 }
  0x5f   : > { %920 = vmatpush1.bf16.msra.mxu0 %v2955_v46  ;;  %979 = vmatpush1.bf16.msra.mxu1 %v2955_v46 }
  0x60   : > { %921 = vmatprep.subr.bf16.mxu0 %v2960_v47  ;;  %980 = vmatprep.subr.bf16.mxu1 %v2960_v47 }
  0x63   : > { %922 = vmatpush1.bf16.msra.mxu0 %v2958_v48  ;;  %981 = vmatpush1.bf16.msra.mxu1 %v2958_v48 }
  0x64   : > { %923 = vmatprep.subr.bf16.mxu0 %v2963_v49  ;;  %982 = vmatprep.subr.bf16.mxu1 %v2963_v49 }
  0x67   : > { %924 = vmatpush1.bf16.msra.mxu0 %v2961_v50  ;;  %983 = vmatpush1.bf16.msra.mxu1 %v2961_v50 }
  0x68   : > { %933 = vmatprep.subr.bf16.mxu0 %v2966_v51  ;;  %992 = vmatprep.subr.bf16.mxu1 %v2966_v51 }
  0x6b   : > { %934 = vmatpush2.bf16.msra.mxu0 %v2964_v52  ;;  %993 = vmatpush2.bf16.msra.mxu1 %v2964_v52 }
  0x6c   : > { %935 = vmatprep.subr.bf16.mxu0 %v2969_v58  ;;  %994 = vmatprep.subr.bf16.mxu1 %v2969_v58 }
  0x6f   : > { %936 = vmatpush2.bf16.msra.mxu0 %v2967_v57  ;;  %995 = vmatpush2.bf16.msra.mxu1 %v2967_v57  ;;  %v2976_v57 = vld [vmem:[%s4000_s3 + $0x70] ss:$8 sps:$4 sm:$0xff]  }
  0x70   : > { %937 = vmatprep.subr.bf16.mxu0 %v2972_v0  ;;  %996 = vmatprep.subr.bf16.mxu1 %v2972_v0 }
  0x73   : > { %938 = vmatpush2.bf16.msra.mxu0 %v2970_v2  ;;  %997 = vmatpush2.bf16.msra.mxu1 %v2970_v2 }
  0x74   : > { %939 = vmatprep.subr.bf16.mxu0 %v2975_v14  ;;  %998 = vmatprep.subr.bf16.mxu1 %v2975_v14  ;;  %v2994_v14 = vld [vmem:[%s4000_s3 + $0x10] ss:$8 sps:$4 sm:$0xff]  }
  0x77   : > { %940 = vmatpush2.bf16.msra.mxu0 %v2973_v17  ;;  %999 = vmatpush2.bf16.msra.mxu1 %v2973_v17  ;;  %v3002_v17 = vld [vmem:[%s4000_s3 + $0xb4] ss:$8 sps:$4 sm:$0xff]  }
  0x78   : > { %1131 = vmatprep.subr.bf16.mxu0 %v2978_v24  ;;  %1172 = vmatprep.subr.bf16.mxu1 %v2978_v24  ;;  %v3009_v24 = vld [vmem:[%s4000_s3 + $0x80] ss:$8 sps:$4 sm:$0xff]  }
 0x109   : > { %v643_v53 = vpop.f32.mrf.mxu1  ;;  %v3453_v54 = vpop.f32.mrf.mxu0 }
 0x10b   : > { %v645_v55 = vpop.f32.mrf.mxu1  ;;  %v594_v56 = vpop.f32.mrf.mxu0 }
 0x10d   : > { %v646_v59 = vpop.f32.mrf.mxu1  ;;  %v596_v60 = vpop.f32.mrf.mxu0 }
 0x10e   : > { %v664_v3 = vrot.slane %v596_v60, 4  ;;  %v670_v6 = vrot.slane %v646_v59, 4 }
 0x10f   : > { %v648_v61 = vpop.f32.mrf.mxu1  ;;  %v598_v62 = vpop.f32.mrf.mxu0 }
 0x110   : > { %v667_v7 = vrot.slane %v598_v62, 4 }
 0x111   : > { %v651_v63 = vpop.f32.mrf.mxu1  ;;  %v602_v1 = vpop.f32.mrf.mxu0 }
 0x112   : > { %v665_v4 = vrot.slane %v602_v1, 4  ;;  %v671_v9 = vrot.slane %v651_v63, 4 }
 0x113   : > { %v653_v5 = vpop.f32.mrf.mxu1  ;;  %v604_v8 = vpop.f32.mrf.mxu0 }
 0x114   : > { %v682_v10 = vmax.f32 %v596_v60, %v665_v4  ;;  %v668_v11 = vrot.slane %v604_v8, 4  ;;  %v666_v13 = vsel %vm663_vm2, %v664_v3, %v665_v4  ;;  %v672_v23 = vsel %vm663_vm2, %v670_v6, %v671_v9  ;;  %v2981_v60 = vld [vmem:[%s4000_s3 + $0x64] ss:$8 sps:$4 sm:$0xff]   ;;  %v2979_v3 = vld [vmem:[%s4000_s3 + $0x60] ss:$8 sps:$4 sm:$0xff]  }
 0x115   : > { %v654_v12 = vpop.f32.mrf.mxu1  ;;  %v606_v15 = vpop.f32.mrf.mxu0  ;;  %v679_v16 = vmax.f32 %v3453_v54, %v666_v13  ;;  %v684_v25 = vmax.f32 %v646_v59, %v671_v9  ;;  %v681_v26 = vmax.f32 %v643_v53, %v672_v23  ;;  %v2984_v5 = vld [vmem:[%s4000_s3 + $0x54] ss:$8 sps:$4 sm:$0xff]   ;;  %v2982_v6 = vld [vmem:[%s4000_s3 + $0x50] ss:$8 sps:$4 sm:$0xff]   ;;  %v2985_v8 = vld [vmem:[%s4000_s3 + $0x40] ss:$8 sps:$4 sm:$0xff]  }
 0x116   : > { %v683_v19 = vmax.f32 %v598_v62, %v668_v11  ;;  %v669_v20 = vsel %vm663_vm2, %v667_v7, %v668_v11  ;;  %v2987_v7 = vld [vmem:[%s4000_s3 + $0x44] ss:$8 sps:$4 sm:$0xff]   ;;  %v2990_v9 = vld [vmem:[%s4000_s3 + $0x34] ss:$8 sps:$4 sm:$0xff]   ;;  %v2991_v12 = vld [vmem:[%s4000_s3 + $0x20] ss:$8 sps:$4 sm:$0xff]  }
 0x117   : > { %v655_v18 = vpop.f32.mrf.mxu1  ;;  %v607_v21 = vpop.f32.mrf.mxu0  ;;  %v680_v22 = vmax.f32 %v594_v56, %v669_v20  ;;  %v2993_v11 = vld [vmem:[%s4000_s3 + $0x24] ss:$8 sps:$4 sm:$0xff]   ;;  %v2996_v13 = vld [vmem:[%s4000_s3 + $0x14] ss:$8 sps:$4 sm:$0xff]   ;;  %v3003_v20 = vld [vmem:[%s4000_s3 + $0xa0] ss:$8 sps:$4 sm:$0xff]  }
 0x118   : > { %693 = vrot.lane.b32.xlu1 %v683_v19, %s3256_s22  ;;  %v2999_v15 = vld [vmem:[%s4000_s3 + $0x4] ss:$8 sps:$4 sm:$0xff]   ;;  %v3000_v18 = vld [vmem:[%s4000_s3 + $0xb0] ss:$8 sps:$4 sm:$0xff]   ;;  %v3008_v21 = vld [vmem:[%s4000_s3 + $0x94] ss:$8 sps:$4 sm:$0xff]  }
 0x119   : > { %689 = vrot.lane.b32.xlu0 %v680_v22, %s3256_s22  ;;  %v3011_v23 = vld [vmem:[%s4000_s3 + $0x84] ss:$8 sps:$4 sm:$0xff]  }
 0x11c   : > { %695 = vrot.lane.b32.xlu1 %v684_v25, %s3256_s22  ;;  %v3014_v25 = vld [vmem:[%s4000_s3 + $0x1f4] ss:$8 sps:$4 sm:$0xff]  }
 0x11d   : > { %691 = vrot.lane.b32.xlu0 %v681_v26, %s3256_s22  ;;  %s2404_s22 = sshll.u32 %s339_s21, 4  ;;  %s2405_s22 = int_to_ptr.vmem [resolvable:$true] %s2404_s22 }
 0x11e   : > { %s3186_s27 = scalar_lea.vmem %s2405_s22, 16  ;;  %p3193_p11 = scmp.lt.s32.totalorder %s2405_s22, %s3191_s29 }
 0x11f   : > { %p3187_p8 = scmp.ne.s32.totalorder %s2405_s22, %s3186_s27  ;;  %p3194_p12 = scmp.lt.s32.totalorder %s3192_s13, %s3186_s27 }
 0x121   : > { %p3188_p9 = pnand %p3187_p8, %p3348_p5  ;;  %p3195_p13 = por %p3194_p12, %p3193_p11 }
 0x123   : > { %p3189_p10 = pneg %p3188_p9 }
 0x125   : > { %p3196_p0 = pnand %p3195_p13, %p3189_p10 }
 0x18a   : > { %v694_v30 = vpop.permute.xlu1 %693 }
 0x18b   : > { %v690_v33 = vpop.permute.xlu0 %689 }
 0x18e   : > { %v696_v36 = vpop.permute.xlu1 %695 }
 0x18f   : > { %v699_v37 = vsel %vm697_vm3, %v694_v30, %v696_v36  ;;  %v707_v38 = vmax.f32 %v683_v19, %v696_v36  ;;  %v692_v39 = vpop.permute.xlu0 %691  ;;  %v3005_v19 = vld [vmem:[%s4000_s3 + $0xa4] ss:$8 sps:$4 sm:$0xff]  }
 0x190   : > { %v706_v40 = vmax.f32 %v682_v10, %v699_v37  ;;  %v698_v41 = vsel %vm697_vm3, %v690_v33, %v692_v39  ;;  %v705_v42 = vmax.f32 %v680_v22, %v692_v39  ;;  %v2988_v10 = vld [vmem:[%s4000_s3 + $0x30] ss:$8 sps:$4 sm:$0xff]   ;;  %v3020_v33 = vld [vmem:[%s4000_s3 + $0x1d4] ss:$8 sps:$4 sm:$0xff]   ;;  %v3023_v36 = vld [vmem:[%s4000_s3 + $0x1c4] ss:$8 sps:$4 sm:$0xff]  }
 0x191   : > { %v723_v43 = vadd.f32 %v717_v34, %v707_v38  ;;  %v704_v44 = vmax.f32 %v679_v16, %v698_v41  ;;  %v2997_v16 = vld [vmem:[%s4000_s3] ss:$8 sps:$4 sm:$0xff]   ;;  %v3006_v22 = vld [vmem:[%s4000_s3 + $0x90] ss:$8 sps:$4 sm:$0xff]   ;;  %v3026_v38 = vld [vmem:[%s4000_s3 + $0x1b4] ss:$8 sps:$4 sm:$0xff]  }
 0x192   : > { %v722_v45 = vadd.f32 %v713_v35, %v706_v40  ;;  %v721_v46 = vadd.f32 %v717_v34, %v705_v42  ;;  %v3021_v37 = vld [vmem:[%s4000_s3 + $0x1c0] ss:$8 sps:$4 sm:$0xff]   ;;  %v3024_v39 = vld [vmem:[%s4000_s3 + $0x1b0] ss:$8 sps:$4 sm:$0xff]   ;;  %v3029_v40 = vld [vmem:[%s4000_s3 + $0x1a4] ss:$8 sps:$4 sm:$0xff]  }
 0x193   : > { %v3485_v47 = vmax.f32 %v723_v43, 0.0  ;;  %v720_v48 = vadd.f32 %v713_v35, %v704_v44  ;;  %v3018_v35 = vld [vmem:[%s4000_s3 + $0x1d0] ss:$8 sps:$4 sm:$0xff]   ;;  %v3027_v41 = vld [vmem:[%s4000_s3 + $0x1a0] ss:$8 sps:$4 sm:$0xff]  }
 0x194   : > { %v3487_v49 = vmax.f32 %v722_v45, 0.0  ;;  %v725_v50 = vmax.f32 %v721_v46, 0.0  ;;  %v3032_v42 = vld [vmem:[%s4000_s3 + $0x194] ss:$8 sps:$4 sm:$0xff]   ;;  %v3030_v43 = vld [vmem:[%s4000_s3 + $0x190] ss:$8 sps:$4 sm:$0xff]  }
 0x195   : > { %v724_v51 = vmax.f32 %v720_v48, 0.0  ;;  %v3035_v44 = vld [vmem:[%s4000_s3 + $0x184] ss:$8 sps:$4 sm:$0xff]   ;;  %v3033_v45 = vld [vmem:[%s4000_s3 + $0x180] ss:$8 sps:$4 sm:$0xff]  }
 0x196   : > { %v3489_v52 = vpack.c.bf16 %v725_v50, %v725_v50  ;;  %v3492_v53 = vpack.c.bf16 %v3485_v47, %v725_v50  ;;  %v3038_v46 = vld [vmem:[%s4000_s3 + $0x234] ss:$8 sps:$4 sm:$0xff]   ;;  %v3036_v48 = vld [vmem:[%s4000_s3 + $0x230] ss:$8 sps:$4 sm:$0xff]   ;;  %v3041_v50 = vld [vmem:[%s4000_s3 + $0x224] ss:$8 sps:$4 sm:$0xff]  }
 0x197   : > { %v3494_v54 = vpack.c.bf16 %v724_v51, %v724_v51  ;;  %v3497_v55 = vpack.c.bf16 %v3487_v49, %v724_v51  ;;  %v3039_v51 = vld [vmem:[%s4000_s3 + $0x220] ss:$8 sps:$4 sm:$0xff]  }
 0x198   : > { %v784_v56 = vrot.slane %v3492_v53, 3  ;;  %v960_v58 = vshll.u32 %v3489_v52, 16  ;;  %v958_v62 = vshrl.u32 %v3489_v52, 16  ;;  %v1408_v26 = vshrl.u32 %v3492_v53, 16 }
 0x199   : > { %v783_v59 = vrot.slane %v3497_v55, 3  ;;  %v953_v61 = vshll.u32 %v3494_v54, 16  ;;  %v951_v0 = vshrl.u32 %v3494_v54, 16  ;;  %v1411_v27 = vshll.u32 %v3492_v53, 16  ;;  %v3044_v53 = vld [vmem:[%s4000_s3 + $0x214] ss:$8 sps:$4 sm:$0xff]  }
 0x19a   : > { %2562 = vmatprep.mubr.msk.bf16.mxu0 %vm697_vm3, %v784_v56  ;;  %v962_v63 = vrot.slane %v960_v58, 1  ;;  %v1410_v30 = vrot.slane %v1408_v26, 3  ;;  %v3045_v58 = vld [vmem:[%s4000_s3 + $0x200] ss:$8 sps:$4 sm:$0xff]   ;;  %v3089_v26 = vld [vmem:[%s4000_s3 + $0x364] ss:$8 sps:$4 sm:$0xff]  }
 0x19b   : > { %942 = vmatmul.mubr.bf16.vlgmr.msra.gmra.mxu0 %v783_v59  ;;  %v955_v1 = vrot.slane %v953_v61, 1  ;;  %v1413_v31 = vrot.slane %v1411_v27, 4  ;;  %v1403_v61 = vshll.u32 %v3497_v55, 16  ;;  %v3087_v27 = vld [vmem:[%s4000_s3 + $0x360] ss:$8 sps:$4 sm:$0xff]  }
 0x19c   : > { %1132 = vmatpush1.bf16.msra.mxu0 %v2976_v57  ;;  %2588 = vmatprep.mubr.msk.bf16.mxu0 %vm697_vm3, %v3489_v52  ;;  %v3516_v2 = vor.u32 %v962_v63, %v958_v62  ;;  %v3048_v62 = vld [vmem:[%s4000_s3 + $0x2b0] ss:$8 sps:$4 sm:$0xff]  }
 0x19d   : > { %1133 = vmatprep.subr.bf16.mxu0 %v2981_v60  ;;  %v3521_v4 = vor.u32 %v955_v1, %v951_v0  ;;  %v3609_v34 = vor.u32 %v1413_v31, %v1410_v30  ;;  %v1405_v0 = vrot.slane %v1403_v61, 4  ;;  %v3053_v1 = vld [vmem:[%s4000_s3 + $0x2a4] ss:$8 sps:$4 sm:$0xff]   ;;  %v1890_v30 = vpack.c.bf16 %v3485_v47, %v3485_v47  ;;  %v3093_v47 = vld [vmem:[%s4000_s3 + $0x340] ss:$8 sps:$4 sm:$0xff]  }
 0x19e   : > { %2563 = vmatprep.mubr.msk.bf16.mxu1 %vm697_vm3, %v3516_v2  ;;  %v3095_v31 = vld [vmem:[%s4000_s3 + $0x344] ss:$8 sps:$4 sm:$0xff]  }
 0x19f   : > { %1001 = vmatmul.mubr.bf16.vlgmr.msra.gmra.mxu1 %v3521_v4 }
 0x1a0   : > { %1134 = vmatpush1.bf16.msra.mxu0 %v2979_v3  ;;  %1173 = vmatpush1.bf16.msra.mxu1 %v2976_v57  ;;  %v3047_v57 = vld [vmem:[%s4000_s3 + $0x204] ss:$8 sps:$4 sm:$0xff]  }
 0x1a1   : > { %2589 = vmatprep.mubr.msk.bf16.mxu1 %vm697_vm3, %v784_v56  ;;  %1135 = vmatprep.subr.bf16.mxu0 %v2984_v5  ;;  %v3042_v56 = vld [vmem:[%s4000_s3 + $0x210] ss:$8 sps:$4 sm:$0xff]  }
 0x1a2   : > { %1174 = vmatprep.subr.bf16.mxu1 %v2981_v60  ;;  %v1400_v60 = vshrl.u32 %v3497_v55, 16  ;;  %v3051_v55 = vld [vmem:[%s4000_s3 + $0x2a0] ss:$8 sps:$4 sm:$0xff]  }
 0x1a4   : > { %1136 = vmatpush1.bf16.msra.mxu0 %v2982_v6  ;;  %1175 = vmatpush1.bf16.msra.mxu1 %v2979_v3  ;;  %v1402_v63 = vrot.slane %v1400_v60, 3  ;;  %v3056_v3 = vld [vmem:[%s4000_s3 + $0x294] ss:$8 sps:$4 sm:$0xff]  }
 0x1a5   : > { %1137 = vmatprep.subr.bf16.mxu0 %v2987_v7  ;;  %1176 = vmatprep.subr.bf16.mxu1 %v2984_v5  ;;  %v3054_v5 = vld [vmem:[%s4000_s3 + $0x290] ss:$8 sps:$4 sm:$0xff]  }
 0x1a8   : > { %1138 = vmatpush1.bf16.msra.mxu0 %v2985_v8  ;;  %1177 = vmatpush1.bf16.msra.mxu1 %v2982_v6  ;;  %v3059_v6 = vld [vmem:[%s4000_s3 + $0x284] ss:$8 sps:$4 sm:$0xff]  }
 0x1a9   : > { %1139 = vmatprep.subr.bf16.mxu0 %v2990_v9  ;;  %1178 = vmatprep.subr.bf16.mxu1 %v2987_v7  ;;  %v3057_v7 = vld [vmem:[%s4000_s3 + $0x280] ss:$8 sps:$4 sm:$0xff]  }
 0x1ac   : > { %1140 = vmatpush1.bf16.msra.mxu0 %v2988_v10  ;;  %1179 = vmatpush1.bf16.msra.mxu1 %v2985_v8  ;;  %v3062_v8 = vld [vmem:[%s4000_s3 + $0x274] ss:$8 sps:$4 sm:$0xff]  }
 0x1ad   : > { %1141 = vmatprep.subr.bf16.mxu0 %v2993_v11  ;;  %1180 = vmatprep.subr.bf16.mxu1 %v2990_v9  ;;  %v3060_v9 = vld [vmem:[%s4000_s3 + $0x270] ss:$8 sps:$4 sm:$0xff]  }
 0x1b0   : > { %1142 = vmatpush1.bf16.msra.mxu0 %v2991_v12  ;;  %1181 = vmatpush1.bf16.msra.mxu1 %v2988_v10  ;;  %v3065_v10 = vld [vmem:[%s4000_s3 + $0x264] ss:$8 sps:$4 sm:$0xff]  }
 0x1b1   : > { %1143 = vmatprep.subr.bf16.mxu0 %v2996_v13  ;;  %1182 = vmatprep.subr.bf16.mxu1 %v2993_v11  ;;  %v3063_v11 = vld [vmem:[%s4000_s3 + $0x260] ss:$8 sps:$4 sm:$0xff]  }
 0x1b4   : > { %1144 = vmatpush1.bf16.msra.mxu0 %v2994_v14  ;;  %1183 = vmatpush1.bf16.msra.mxu1 %v2991_v12  ;;  %v3068_v12 = vld [vmem:[%s4000_s3 + $0x254] ss:$8 sps:$4 sm:$0xff]  }
 0x1b5   : > { %1145 = vmatprep.subr.bf16.mxu0 %v2999_v15  ;;  %1184 = vmatprep.subr.bf16.mxu1 %v2996_v13  ;;  %v3066_v13 = vld [vmem:[%s4000_s3 + $0x250] ss:$8 sps:$4 sm:$0xff]  }
 0x1b8   : > { %1146 = vmatpush1.bf16.msra.mxu0 %v2997_v16  ;;  %1185 = vmatpush1.bf16.msra.mxu1 %v2994_v14  ;;  %v3071_v14 = vld [vmem:[%s4000_s3 + $0x244] ss:$8 sps:$4 sm:$0xff]  }
 0x1b9   : > { %1155 = vmatprep.subr.bf16.mxu0 %v3002_v17  ;;  %1186 = vmatprep.subr.bf16.mxu1 %v2999_v15  ;;  %v3069_v15 = vld [vmem:[%s4000_s3 + $0x240] ss:$8 sps:$4 sm:$0xff]  }
 0x1bc   : > { %1156 = vmatpush2.bf16.msra.mxu0 %v3000_v18  ;;  %1187 = vmatpush1.bf16.msra.mxu1 %v2997_v16  ;;  %v3074_v16 = vld [vmem:[%s4000_s3 + $0x2f4] ss:$8 sps:$4 sm:$0xff]  }
 0x1bd   : > { %1157 = vmatprep.subr.bf16.mxu0 %v3005_v19  ;;  %1196 = vmatprep.subr.bf16.mxu1 %v3002_v17  ;;  %v3072_v17 = vld [vmem:[%s4000_s3 + $0x2f0] ss:$8 sps:$4 sm:$0xff]  }
 0x1c0   : > { %1158 = vmatpush2.bf16.msra.mxu0 %v3003_v20  ;;  %1197 = vmatpush2.bf16.msra.mxu1 %v3000_v18  ;;  %v3077_v18 = vld [vmem:[%s4000_s3 + $0x2e4] ss:$8 sps:$4 sm:$0xff]  }
 0x1c1   : > { %1159 = vmatprep.subr.bf16.mxu0 %v3008_v21  ;;  %1198 = vmatprep.subr.bf16.mxu1 %v3005_v19  ;;  %v3075_v19 = vld [vmem:[%s4000_s3 + $0x2e0] ss:$8 sps:$4 sm:$0xff]  }
 0x1c4   : > { %1160 = vmatpush2.bf16.msra.mxu0 %v3006_v22  ;;  %1199 = vmatpush2.bf16.msra.mxu1 %v3003_v20  ;;  %v3080_v20 = vld [vmem:[%s4000_s3 + $0x2d4] ss:$8 sps:$4 sm:$0xff]  }
 0x1c5   : > { %1161 = vmatprep.subr.bf16.mxu0 %v3011_v23  ;;  %1200 = vmatprep.subr.bf16.mxu1 %v3008_v21  ;;  %v3078_v21 = vld [vmem:[%s4000_s3 + $0x2d0] ss:$8 sps:$4 sm:$0xff]  }
 0x1c8   : > { %1162 = vmatpush2.bf16.msra.mxu0 %v3009_v24  ;;  %1201 = vmatpush2.bf16.msra.mxu1 %v3006_v22  ;;  %v3083_v22 = vld [vmem:[%s4000_s3 + $0x2c4] ss:$8 sps:$4 sm:$0xff]  }
 0x1c9   : > { %1202 = vmatprep.subr.bf16.mxu1 %v3011_v23  ;;  %1358 = vmatprep.subr.bf16.mxu0 %v3014_v25  ;;  %v3081_v23 = vld [vmem:[%s4000_s3 + $0x2c0] ss:$8 sps:$4 sm:$0xff]  }
 0x1cb   : > { %1164 = vmatmul.mubr.bf16.vlgmr.msra.gmra.mxu0 %v3494_v54 }
 0x1cc   : > { %1203 = vmatpush2.bf16.msra.mxu1 %v3009_v24  ;;  %1359 = vmatpush1.bf16.msra.mxu0 %v3012_v28  ;;  %v3086_v24 = vld [vmem:[%s4000_s3 + $0x374] ss:$8 sps:$4 sm:$0xff]  }
 0x1cd   : > { %2638 = vmatprep.mubr.msk.bf16.mxu0 %vm697_vm3, %v3516_v2  ;;  %1360 = vmatprep.subr.bf16.mxu0 %v3017_v29  ;;  %v3687_v2 = vor.u32 %v1405_v0, %v1402_v63  ;;  %v3123_v63 = vld [vmem:[%s4002_s5 + $0xb8] sm:$0xff]   ;;  %v3124_v0 = vld [vmem:[%s4002_s5 + $0x70] sm:$0xff]  }
 0x1ce   : > { %1419 = vmatprep.subr.bf16.mxu1 %v3014_v25  ;;  %v3084_v25 = vld [vmem:[%s4000_s3 + $0x370] ss:$8 sps:$4 sm:$0xff]  }
 0x1cf   : > { %1205 = vmatmul.mubr.bf16.vlgmr.msra.gmra.mxu1 %v783_v59  ;;  %v3050_v59 = vld [vmem:[%s4000_s3 + $0x2b4] ss:$8 sps:$4 sm:$0xff]  }
 0x1d0   : > { %1361 = vmatpush1.bf16.msra.mxu0 %v3015_v32  ;;  %1420 = vmatpush1.bf16.msra.mxu1 %v3012_v28  ;;  %v1652_v28 = vrot.slane %v3494_v54, 1  ;;  %v3121_v54 = vld [vmem:[%s4002_s5 + $0xf8] sm:$0xff]  }
 0x1d1   : > { %2639 = vmatprep.mubr.msk.bf16.mxu1 %vm697_vm3, %v3609_v34  ;;  %1362 = vmatprep.subr.bf16.mxu0 %v3020_v33 }
 0x1d2   : > { %1421 = vmatprep.subr.bf16.mxu1 %v3017_v29  ;;  %v3092_v29 = vld [vmem:[%s4000_s3 + $0x354] ss:$8 sps:$4 sm:$0xff]  }
 0x1d4   : > { %1363 = vmatpush1.bf16.msra.mxu0 %v3018_v35  ;;  %1422 = vmatpush1.bf16.msra.mxu1 %v3015_v32  ;;  %v3098_v32 = vld [vmem:[%s4000_s3 + $0x334] ss:$8 sps:$4 sm:$0xff]  }
 0x1d5   : > { %1364 = vmatprep.subr.bf16.mxu0 %v3023_v36  ;;  %1423 = vmatprep.subr.bf16.mxu1 %v3020_v33  ;;  %v3096_v33 = vld [vmem:[%s4000_s3 + $0x330] ss:$8 sps:$4 sm:$0xff]  }
 0x1d8   : > { %1365 = vmatpush1.bf16.msra.mxu0 %v3021_v37  ;;  %1424 = vmatpush1.bf16.msra.mxu1 %v3018_v35  ;;  %v3099_v35 = vld [vmem:[%s4000_s3 + $0x320] ss:$8 sps:$4 sm:$0xff]  }
 0x1d9   : > { %1366 = vmatprep.subr.bf16.mxu0 %v3026_v38  ;;  %1425 = vmatprep.subr.bf16.mxu1 %v3023_v36  ;;  %v3104_v36 = vld [vmem:[%s4000_s3 + $0x314] ss:$8 sps:$4 sm:$0xff]  }
 0x1dc   : > { %1367 = vmatpush1.bf16.msra.mxu0 %v3024_v39  ;;  %1426 = vmatpush1.bf16.msra.mxu1 %v3021_v37  ;;  %v3102_v37 = vld [vmem:[%s4000_s3 + $0x310] ss:$8 sps:$4 sm:$0xff]  }
 0x1dd   : > { %1368 = vmatprep.subr.bf16.mxu0 %v3029_v40  ;;  %1427 = vmatprep.subr.bf16.mxu1 %v3026_v38  ;;  %v3107_v38 = vld [vmem:[%s4000_s3 + $0x304] ss:$8 sps:$4 sm:$0xff]  }
 0x1e0   : > { %1369 = vmatpush1.bf16.msra.mxu0 %v3027_v41  ;;  %1428 = vmatpush1.bf16.msra.mxu1 %v3024_v39  ;;  %v3105_v39 = vld [vmem:[%s4000_s3 + $0x300] ss:$8 sps:$4 sm:$0xff]  }
 0x1e1   : > { %1370 = vmatprep.subr.bf16.mxu0 %v3032_v42  ;;  %1429 = vmatprep.subr.bf16.mxu1 %v3029_v40  ;;  %v3110_v40 = vld [vmem:[%s4000_s3 + $0x3b4] ss:$8 sps:$4 sm:$0xff]  }
 0x1e4   : > { %1371 = vmatpush1.bf16.msra.mxu0 %v3030_v43  ;;  %1430 = vmatpush1.bf16.msra.mxu1 %v3027_v41  ;;  %v3108_v41 = vld [vmem:[%s4000_s3 + $0x3b0] ss:$8 sps:$4 sm:$0xff]  }
 0x1e5   : > { %1372 = vmatprep.subr.bf16.mxu0 %v3035_v44  ;;  %1431 = vmatprep.subr.bf16.mxu1 %v3032_v42  ;;  %v3113_v42 = vld [vmem:[%s4000_s3 + $0x3a4] ss:$8 sps:$4 sm:$0xff]  }
 0x1e8   : > { %1373 = vmatpush1.bf16.msra.mxu0 %v3033_v45  ;;  %1432 = vmatpush1.bf16.msra.mxu1 %v3030_v43  ;;  %v3111_v43 = vld [vmem:[%s4000_s3 + $0x3a0] ss:$8 sps:$4 sm:$0xff]  }
 0x1e9   : > { %1382 = vmatprep.subr.bf16.mxu0 %v3038_v46  ;;  %1433 = vmatprep.subr.bf16.mxu1 %v3035_v44  ;;  %v3116_v44 = vld [vmem:[%s4000_s3 + $0x394] ss:$8 sps:$4 sm:$0xff]  }
 0x1ec   : > { %1383 = vmatpush2.bf16.msra.mxu0 %v3036_v48  ;;  %1434 = vmatpush1.bf16.msra.mxu1 %v3033_v45  ;;  %v3114_v45 = vld [vmem:[%s4000_s3 + $0x390] ss:$8 sps:$4 sm:$0xff]  }
 0x1ed   : > { %1384 = vmatprep.subr.bf16.mxu0 %v3041_v50  ;;  %1443 = vmatprep.subr.bf16.mxu1 %v3038_v46  ;;  %v3119_v46 = vld [vmem:[%s4000_s3 + $0x384] ss:$8 sps:$4 sm:$0xff]  }
 0x1f0   : > { %1385 = vmatpush2.bf16.msra.mxu0 %v3039_v51  ;;  %1444 = vmatpush2.bf16.msra.mxu1 %v3036_v48  ;;  %v3117_v48 = vld [vmem:[%s4000_s3 + $0x380] ss:$8 sps:$4 sm:$0xff]  }
 0x1f1   : > { %1386 = vmatprep.subr.bf16.mxu0 %v3044_v53  ;;  %1445 = vmatprep.subr.bf16.mxu1 %v3041_v50 }
 0x1f4   : > { %1387 = vmatpush2.bf16.msra.mxu0 %v3042_v56  ;;  %1446 = vmatpush2.bf16.msra.mxu1 %v3039_v51  ;;  %v1889_v51 = vpack.c.bf16 %v3487_v49, %v3487_v49  ;;  %v3122_v49 = vld [vmem:[%s4002_s5 + $0x38] sm:$0xff]  }
 0x1f5   : > { %1388 = vmatprep.subr.bf16.mxu0 %v3047_v57  ;;  %1447 = vmatprep.subr.bf16.mxu1 %v3044_v53 }
 0x1f8   : > { %1389 = vmatpush2.bf16.msra.mxu0 %v3045_v58  ;;  %1448 = vmatpush2.bf16.msra.mxu1 %v3042_v56 }
 0x1f9   : > { %1449 = vmatprep.subr.bf16.mxu1 %v3047_v57  ;;  %1609 = vmatprep.subr.bf16.mxu0 %v3050_v59 }
 0x1fb   : > { %1391 = vmatmul.mubr.bf16.vlgmr.msra.gmra.mxu0 %v3521_v4  ;;  %v1653_v4 = vrot.slane %v3489_v52, 1  ;;  %v3090_v52 = vld [vmem:[%s4000_s3 + $0x350] ss:$8 sps:$4 sm:$0xff]  }
 0x1fc   : > { %1450 = vmatpush2.bf16.msra.mxu1 %v3045_v58  ;;  %1610 = vmatpush1.bf16.msra.mxu0 %v3048_v62 }
 0x1fd   : > { %2688 = vmatprep.mubr.msk.bf16.mxu0 %vm697_vm3, %v3609_v34  ;;  %1611 = vmatprep.subr.bf16.mxu0 %v3053_v1  ;;  %v3101_v34 = vld [vmem:[%s4000_s3 + $0x324] ss:$8 sps:$4 sm:$0xff]  }
 0x1fe   : > { %1658 = vmatprep.subr.bf16.mxu1 %v3050_v59 }
 0x1ff   : > { %1452 = vmatmul.mubr.bf16.vlgmr.msra.gmra.mxu1 %v3687_v2 }
 0x200   : > { %1612 = vmatpush1.bf16.msra.mxu0 %v3051_v55  ;;  %1659 = vmatpush1.bf16.msra.mxu1 %v3048_v62  ;;  %v3120_v62 = vld [vmem:[%s4002_s5 + $0x78] sm:$0xff]  }
 0x201   : > { %2689 = vmatprep.mubr.msk.bf16.mxu1 %vm697_vm3, %v1653_v4  ;;  %1613 = vmatprep.subr.bf16.mxu0 %v3056_v3 }
 0x202   : > { %1660 = vmatprep.subr.bf16.mxu1 %v3053_v1  ;;  %v3125_v1 = vld [vmem:[%s4002_s5 + $0xf0] sm:$0xff]  }
 0x204   : > { %1614 = vmatpush1.bf16.msra.mxu0 %v3054_v5  ;;  %1661 = vmatpush1.bf16.msra.mxu1 %v3051_v55  ;;  %v3126_v55 = vld [vmem:[%s4002_s5 + $0x30] sm:$0xff]  }
 0x205   : > { %1615 = vmatprep.subr.bf16.mxu0 %v3059_v6  ;;  %1662 = vmatprep.subr.bf16.mxu1 %v3056_v3  ;;  %v3128_v3 = vld [vmem:[%s4002_s5 + $0x68] sm:$0xff]  }
 0x208   : > { %1616 = vmatpush1.bf16.msra.mxu0 %v3057_v7  ;;  %1663 = vmatpush1.bf16.msra.mxu1 %v3054_v5  ;;  %v3130_v5 = vld [vmem:[%s4002_s5 + $0x28] sm:$0xff]  }
 0x209   : > { %1617 = vmatprep.subr.bf16.mxu0 %v3062_v8  ;;  %1664 = vmatprep.subr.bf16.mxu1 %v3059_v6  ;;  %v3131_v6 = vld [vmem:[%s4002_s5 + $0xa8] sm:$0xff]  }
 0x20c   : > { %1618 = vmatpush1.bf16.msra.mxu0 %v3060_v9  ;;  %1665 = vmatpush1.bf16.msra.mxu1 %v3057_v7 }
 0x20d   : > { %1619 = vmatprep.subr.bf16.mxu0 %v3065_v10  ;;  %1666 = vmatprep.subr.bf16.mxu1 %v3062_v8 }
 0x210   : > { %1620 = vmatpush1.bf16.msra.mxu0 %v3063_v11  ;;  %1667 = vmatpush1.bf16.msra.mxu1 %v3060_v9 }
 0x211   : > { %1621 = vmatprep.subr.bf16.mxu0 %v3068_v12  ;;  %1668 = vmatprep.subr.bf16.mxu1 %v3065_v10 }
 0x214   : > { %1622 = vmatpush1.bf16.msra.mxu0 %v3066_v13  ;;  %1669 = vmatpush1.bf16.msra.mxu1 %v3063_v11 }
 0x215   : > { %1623 = vmatprep.subr.bf16.mxu0 %v3071_v14  ;;  %1670 = vmatprep.subr.bf16.mxu1 %v3068_v12 }
 0x218   : > { %1624 = vmatpush1.bf16.msra.mxu0 %v3069_v15  ;;  %1671 = vmatpush1.bf16.msra.mxu1 %v3066_v13 }
 0x219   : > { %1633 = vmatprep.subr.bf16.mxu0 %v3074_v16  ;;  %1672 = vmatprep.subr.bf16.mxu1 %v3071_v14 }
 0x21c   : > { %1634 = vmatpush2.bf16.msra.mxu0 %v3072_v17  ;;  %1673 = vmatpush1.bf16.msra.mxu1 %v3069_v15 }
 0x21d   : > { %1635 = vmatprep.subr.bf16.mxu0 %v3077_v18  ;;  %1682 = vmatprep.subr.bf16.mxu1 %v3074_v16 }
 0x220   : > { %1636 = vmatpush2.bf16.msra.mxu0 %v3075_v19  ;;  %1683 = vmatpush2.bf16.msra.mxu1 %v3072_v17 }
 0x221   : > { %1637 = vmatprep.subr.bf16.mxu0 %v3080_v20  ;;  %1684 = vmatprep.subr.bf16.mxu1 %v3077_v18 }
 0x224   : > { %1638 = vmatpush2.bf16.msra.mxu0 %v3078_v21  ;;  %1685 = vmatpush2.bf16.msra.mxu1 %v3075_v19  ;;  %v3132_v19 = vld [vmem:[%s4002_s5 + $0x60] sm:$0xff]  }
 0x225   : > { %1639 = vmatprep.subr.bf16.mxu0 %v3083_v22  ;;  %1686 = vmatprep.subr.bf16.mxu1 %v3080_v20  ;;  %v3133_v20 = vld [vmem:[%s4002_s5 + $0xe0] sm:$0xff]  }
 0x228   : > { %1640 = vmatpush2.bf16.msra.mxu0 %v3081_v23  ;;  %1687 = vmatpush2.bf16.msra.mxu1 %v3078_v21  ;;  %v3134_v21 = vld [vmem:[%s4002_s5 + $0x20] sm:$0xff]  }
 0x229   : > { %1688 = vmatprep.subr.bf16.mxu1 %v3083_v22  ;;  %1848 = vmatprep.subr.bf16.mxu0 %v3086_v24  ;;  %v3135_v22 = vld [vmem:[%s4002_s5 + $0xa0] sm:$0xff]  }
 0x22b   : > { %1642 = vmatmul.mubr.bf16.vlgmr.msra.gmra.mxu0 %v3687_v2  ;;  %v3127_v2 = vld [vmem:[%s4002_s5 + $0xb0] sm:$0xff]  }
 0x22c   : > { %1689 = vmatpush2.bf16.msra.mxu1 %v3081_v23  ;;  %1849 = vmatpush1.bf16.msra.mxu0 %v3084_v25  ;;  %v3136_v23 = vld [vmem:[%s4002_s5 + $0x58] sm:$0xff]  }
 0x22d   : > { %2738 = vmatprep.mubr.msk.bf16.mxu0 %vm697_vm3, %v1653_v4  ;;  %1850 = vmatprep.subr.bf16.mxu0 %v3089_v26  ;;  %v3129_v4 = vld [vmem:[%s4002_s5 + $0xe8] sm:$0xff]  }
 0x22e   : > { %1894 = vmatprep.subr.bf16.mxu1 %v3086_v24  ;;  %v3137_v24 = vld [vmem:[%s4002_s5 + $0xd8] sm:$0xff]  }
 0x22f   : > { %1691 = vmatmul.mubr.bf16.vlgmr.msra.gmra.mxu1 %v1652_v28 }
 0x230   : > { %1851 = vmatpush1.bf16.msra.mxu0 %v3087_v27  ;;  %1895 = vmatpush1.bf16.msra.mxu1 %v3084_v25  ;;  %v3138_v25 = vld [vmem:[%s4002_s5 + $0x18] sm:$0xff]  }
 0x231   : > { %2739 = vmatprep.mubr.msk.bf16.mxu1 %vm697_vm3, %v1890_v30  ;;  %1852 = vmatprep.subr.bf16.mxu0 %v3092_v29  ;;  %v3143_v30 = vld [vmem:[%s4002_s5 + $0x90] sm:$0xff]  }
 0x232   : > { %1896 = vmatprep.subr.bf16.mxu1 %v3089_v26  ;;  %v3139_v26 = vld [vmem:[%s4002_s5 + $0x98] sm:$0xff]  }
 0x234   : > { %1853 = vmatpush1.bf16.msra.mxu0 %v3090_v52  ;;  %1897 = vmatpush1.bf16.msra.mxu1 %v3087_v27  ;;  %v3140_v27 = vld [vmem:[%s4002_s5 + $0x50] sm:$0xff]  }
 0x235   : > { %1854 = vmatprep.subr.bf16.mxu0 %v3095_v31  ;;  %1898 = vmatprep.subr.bf16.mxu1 %v3092_v29  ;;  %v3142_v29 = vld [vmem:[%s4002_s5 + $0x10] sm:$0xff]  }
 0x238   : > { %1855 = vmatpush1.bf16.msra.mxu0 %v3093_v47  ;;  %1899 = vmatpush1.bf16.msra.mxu1 %v3090_v52  ;;  %v3144_v52 = vld [vmem:[%s4002_s5 + $0x48] sm:$0xff]  }
 0x239   : > { %1856 = vmatprep.subr.bf16.mxu0 %v3098_v32  ;;  %1900 = vmatprep.subr.bf16.mxu1 %v3095_v31  ;;  %v3145_v31 = vld [vmem:[%s4002_s5 + $0xc8] sm:$0xff]  }
 0x23c   : > { %1857 = vmatpush1.bf16.msra.mxu0 %v3096_v33  ;;  %1901 = vmatpush1.bf16.msra.mxu1 %v3093_v47  ;;  %v3146_v47 = vld [vmem:[%s4002_s5 + $0x8] sm:$0xff]  }
 0x23d   : > { %1858 = vmatprep.subr.bf16.mxu0 %v3101_v34  ;;  %1902 = vmatprep.subr.bf16.mxu1 %v3098_v32  ;;  %v3147_v32 = vld [vmem:[%s4002_s5 + $0x88] sm:$0xff]  }
 0x240   : > { %1859 = vmatpush1.bf16.msra.mxu0 %v3099_v35  ;;  %1903 = vmatpush1.bf16.msra.mxu1 %v3096_v33  ;;  %v3148_v33 = vld [vmem:[%s4002_s5 + $0x40] sm:$0xff]  }
 0x241   : > { %1860 = vmatprep.subr.bf16.mxu0 %v3104_v36  ;;  %1904 = vmatprep.subr.bf16.mxu1 %v3101_v34  ;;  %v3149_v34 = vld [vmem:[%s4002_s5 + $0xc0] sm:$0xff]  }
 0x244   : > { %1861 = vmatpush1.bf16.msra.mxu0 %v3102_v37  ;;  %1905 = vmatpush1.bf16.msra.mxu1 %v3099_v35  ;;  %v3150_v35 = vld [vmem:[%s4002_s5] sm:$0xff]  }
 0x245   : > { %1862 = vmatprep.subr.bf16.mxu0 %v3107_v38  ;;  %1906 = vmatprep.subr.bf16.mxu1 %v3104_v36  ;;  %v3151_v36 = vld [vmem:[%s4002_s5 + $0x80] sm:$0xff]  }
 0x248   : > { %1863 = vmatpush1.bf16.msra.mxu0 %v3105_v39  ;;  %1907 = vmatpush1.bf16.msra.mxu1 %v3102_v37  ;;  %v3257_v37 = vmov 0.0  }
 0x249   : > { %1872 = vmatprep.subr.bf16.mxu0 %v3110_v40  ;;  %1908 = vmatprep.subr.bf16.mxu1 %v3107_v38 }
 0x24c   : > { %1873 = vmatpush2.bf16.msra.mxu0 %v3108_v41  ;;  %1909 = vmatpush1.bf16.msra.mxu1 %v3105_v39 }
 0x24d   : > { %1874 = vmatprep.subr.bf16.mxu0 %v3113_v42  ;;  %1918 = vmatprep.subr.bf16.mxu1 %v3110_v40 }
 0x250   : > { %1875 = vmatpush2.bf16.msra.mxu0 %v3111_v43  ;;  %1919 = vmatpush2.bf16.msra.mxu1 %v3108_v41 }
 0x251   : > { %1876 = vmatprep.subr.bf16.mxu0 %v3116_v44  ;;  %1920 = vmatprep.subr.bf16.mxu1 %v3113_v42 }
 0x254   : > { %1877 = vmatpush2.bf16.msra.mxu0 %v3114_v45  ;;  %1921 = vmatpush2.bf16.msra.mxu1 %v3111_v43 }
 0x255   : > { %1878 = vmatprep.subr.bf16.mxu0 %v3119_v46  ;;  %1922 = vmatprep.subr.bf16.mxu1 %v3116_v44 }
 0x258   : > { %1879 = vmatpush2.bf16.msra.mxu0 %v3117_v48  ;;  %1923 = vmatpush2.bf16.msra.mxu1 %v3114_v45 }
 0x259   : > { %1924 = vmatprep.subr.bf16.mxu1 %v3119_v46  ;;  %2781 = vmatprep.subr.bf16.mxu0 %v3120_v62 }
 0x25b   : > { %1881 = vmatmul.mubr.bf16.vlgmr.msra.gmra.mxu0 %v1652_v28  ;;  %v943_v50 = vpop.f32.mrf.mxu0  ;;  %v3141_v28 = vld [vmem:[%s4002_s5 + $0xd0] sm:$0xff]  }
 0x25c   : > { %1925 = vmatpush2.bf16.msra.mxu1 %v3117_v48  ;;  %2782 = vmatpush3.bf16.msra.mxu0 %v3122_v49 }
 0x25d   : > { %v945_v53 = vpop.f32.mrf.mxu0  ;;  %2803 = vmatprep.subr.bf16.mxu1 %v3121_v54  ;;  %2783 = vmatprep.subr.bf16.mxu0 %v3124_v0 }
 0x25f   : > { %1927 = vmatmul.mubr.bf16.vlgmr.msra.gmra.mxu1 %v1889_v51  ;;  %v947_v56 = vpop.f32.mrf.mxu0  ;;  %v1002_v57 = vpop.f32.mrf.mxu1 }
 0x260   : > { %2804 = vmatpush3.bf16.msra.mxu1 %v3123_v63  ;;  %2784 = vmatpush3.bf16.msra.mxu0 %v3126_v55 }
 0x261   : > { %v948_v58 = vpop.f32.mrf.mxu0  ;;  %v1004_v59 = vpop.f32.mrf.mxu1  ;;  %2805 = vmatprep.subr.bf16.mxu1 %v3125_v1  ;;  %2785 = vmatprep.subr.bf16.mxu0 %v3128_v3 }
 0x263   : > { %v1006_v60 = vpop.f32.mrf.mxu1 }
 0x264   : > { %2806 = vmatpush3.bf16.msra.mxu1 %v3127_v2  ;;  %2786 = vmatpush3.bf16.msra.mxu0 %v3130_v5 }
 0x265   : > { %v1007_v61 = vpop.f32.mrf.mxu1  ;;  %2807 = vmatprep.subr.bf16.mxu1 %v3129_v4  ;;  %2787 = vmatprep.subr.bf16.mxu0 %v3132_v19 }
 0x268   : > { %2808 = vmatpush3.bf16.msra.mxu1 %v3131_v6  ;;  %2788 = vmatpush3.bf16.msra.mxu0 %v3134_v21 }
 0x269   : > { %2809 = vmatprep.subr.bf16.mxu1 %v3133_v20  ;;  %2789 = vmatprep.subr.bf16.mxu0 %v3136_v23 }
 0x26c   : > { %2810 = vmatpush3.bf16.msra.mxu1 %v3135_v22  ;;  %2790 = vmatpush3.bf16.msra.mxu0 %v3138_v25 }
 0x26d   : > { %2811 = vmatprep.subr.bf16.mxu1 %v3137_v24  ;;  %2791 = vmatprep.subr.bf16.mxu0 %v3140_v27  ;;  %v3152_v24 = vld [vmem:[%s4004_s7 + $0x18] sm:$0xff]   ;;  %v3154_v27 = vld [vmem:[%s4004_s7 + $0x8] sm:$0xff]  }
 0x270   : > { %2812 = vmatpush3.bf16.msra.mxu1 %v3139_v26  ;;  %2792 = vmatpush3.bf16.msra.mxu0 %v3142_v29  ;;  %v3153_v26 = vld [vmem:[%s4004_s7 + $0x10] sm:$0xff]  }
 0x271   : > { %2813 = vmatprep.subr.bf16.mxu1 %v3141_v28  ;;  %2793 = vmatprep.subr.bf16.mxu0 %v3144_v52  ;;  %v3155_v28 = vld [vmem:[%s4004_s7] sm:$0xff]  }
 0x272   : > { %v2026_v52 = vld [vmem:[%s4003_s6] sm:$0x1] }
 0x274   : > { %2814 = vmatpush3.bf16.msra.mxu1 %v3143_v30  ;;  %2794 = vmatpush3.bf16.msra.mxu0 %v3146_v47 }
 0x275   : > { %2815 = vmatprep.subr.bf16.mxu1 %v3145_v31  ;;  %2795 = vmatprep.subr.bf16.mxu0 %v3148_v33 }
 0x278   : > { %2816 = vmatpush3.bf16.msra.mxu1 %v3147_v32  ;;  %2796 = vmatpush3.bf16.msra.mxu0 %v3150_v35 }
 0x279   : > { %2817 = vmatprep.subr.bf16.mxu1 %v3149_v34  ;;  %2830 = vmatprep.subr.bf16.mxu0 %v3257_v37 }
 0x27c   : > { %2818 = vmatpush3.bf16.msra.mxu1 %v3151_v36 }
 0x28b   : > { %v1165_v7 = vpop.f32.mrf.mxu0 }
 0x28c   : > { %v1166_v8 = vadd.f32 %v1165_v7, %v943_v50 }
 0x28d   : > { %v1167_v9 = vpop.f32.mrf.mxu0 }
 0x28e   : > { %v1168_v10 = vadd.f32 %v1167_v9, %v945_v53 }
 0x28f   : > { %v1169_v11 = vpop.f32.mrf.mxu0  ;;  %v1206_v12 = vpop.f32.mrf.mxu1 }
 0x290   : > { %v1207_v13 = vadd.f32 %v1206_v12, %v1002_v57 }
 0x291   : > { %v1170_v14 = vpop.f32.mrf.mxu0  ;;  %v1208_v15 = vpop.f32.mrf.mxu1 }
 0x292   : > { %v1209_v16 = vadd.f32 %v1208_v15, %v1004_v59 }
 0x293   : > { %v1210_v17 = vpop.f32.mrf.mxu1 }
 0x295   : > { %v1211_v18 = vpop.f32.mrf.mxu1 }
 0x2bb   : > { %v1392_v38 = vpop.f32.mrf.mxu0 }
 0x2bc   : > { %v1460_v39 = vadd.f32 %v1392_v38, %v1166_v8 }
 0x2bd   : > { %v1394_v40 = vpop.f32.mrf.mxu0 }
 0x2be   : > { %v1461_v41 = vadd.f32 %v1394_v40, %v1168_v10 }
 0x2bf   : > { %v1396_v42 = vpop.f32.mrf.mxu0  ;;  %v1453_v43 = vpop.f32.mrf.mxu1 }
 0x2c0   : > { %v1462_v44 = vadd.f32 %v1453_v43, %v1207_v13  ;;  %v2740_v13 = vld [vmem:[%s4001_s4] ss:$0 sm:$0xff] }
 0x2c1   : > { %v1397_v45 = vpop.f32.mrf.mxu0  ;;  %v1455_v46 = vpop.f32.mrf.mxu1 }
 0x2c2   : > { %v1463_v48 = vadd.f32 %v1455_v46, %v1209_v16 }
 0x2c3   : > { %v1457_v50 = vpop.f32.mrf.mxu1 }
 0x2c5   : > { %v1458_v51 = vpop.f32.mrf.mxu1 }
 0x2eb   : > { %v1643_v53 = vpop.f32.mrf.mxu0 }
 0x2ec   : > { %v1699_v63 = vadd.f32 %v1643_v53, %v1460_v39 }
 0x2ed   : > { %v1645_v56 = vpop.f32.mrf.mxu0 }
 0x2ee   : > { %v1700_v2 = vadd.f32 %v1645_v56, %v1461_v41 }
 0x2ef   : > { %v1647_v57 = vpop.f32.mrf.mxu0  ;;  %v1692_v58 = vpop.f32.mrf.mxu1 }
 0x2f0   : > { %v1701_v0 = vadd.f32 %v1692_v58, %v1462_v44 }
 0x2f1   : > { %v1648_v59 = vpop.f32.mrf.mxu0  ;;  %v1694_v60 = vpop.f32.mrf.mxu1 }
 0x2f2   : > { %v1702_v3 = vadd.f32 %v1694_v60, %v1463_v48 }
 0x2f3   : > { %v1696_v61 = vpop.f32.mrf.mxu1 }
 0x2f5   : > { %v1697_v62 = vpop.f32.mrf.mxu1 }
 0x31b   : > { %v1882_v54 = vpop.f32.mrf.mxu0 }
 0x31c   : > { %v1935_v4 = vadd.f32 %v1882_v54, %v1699_v63 }
 0x31d   : > { %v1884_v49 = vpop.f32.mrf.mxu0 }
 0x31e   : > { %v1936_v8 = vadd.f32 %v1884_v49, %v1700_v2 }
 0x31f   : > { %v1886_v1 = vpop.f32.mrf.mxu0  ;;  %v1928_v55 = vpop.f32.mrf.mxu1 }
 0x320   : > { %v1937_v5 = vadd.f32 %v1928_v55, %v1701_v0 }
 0x321   : > { %v1887_v6 = vpop.f32.mrf.mxu0  ;;  %v1930_v7 = vpop.f32.mrf.mxu1 }
 0x322   : > { %v1939_v9 = vmax.f32 %v1935_v4, %v1937_v5  ;;  %v1938_v10 = vadd.f32 %v1930_v7, %v1702_v3 }
 0x323   : > { %v1932_v11 = vpop.f32.mrf.mxu1 }
 0x324   : > { %v1940_v12 = vmax.f32 %v1936_v8, %v1938_v10 }
 0x325   : > { %v1933_v14 = vpop.f32.mrf.mxu1 }
 0x326   : > { %v1941_v15 = vmax.f32 %v1939_v9, %v1940_v12 }
 0x328   : > { %v1949_v16 = vadd.f32 %v2740_v13, %v1941_v15 }
 0x32a   : > { %v1950_v17 = vmax.f32 %v1949_v16, 0.0 }
 0x32c   : > { %v1952_v18 = vrot.slane %v1950_v17, 1  ;;  %v1956_v19 = vrot.slane %v1950_v17, 3  ;;  %v1954_v20 = vrot.slane %v1950_v17, 2  ;;  %v1958_v25 = vpack.c.bf16 %v1950_v17, %v1950_v17 }
 0x32e   : > { %v1959_v21 = vpack.c.bf16 %v1952_v18, %v1952_v18  ;;  %v1961_v22 = vpack.c.bf16 %v1956_v19, %v1956_v19  ;;  %v1960_v23 = vpack.c.bf16 %v1954_v20, %v1954_v20 }
 0x330   : > { %2251 = vmatprep.mubr.bf16.mxu0 %v1959_v21  ;;  %2291 = vmatprep.mubr.bf16.mxu1 %v1961_v22 }
 0x331   : > { %2252 = vmatmul.mubr.bf16.vlgmr.msra.gmra.mxu0 %v1958_v25  ;;  %2292 = vmatmul.mubr.bf16.vlgmr.msra.gmra.mxu1 %v1960_v23 }
 0x332   : > { %2831 = vmatpush3.bf16.msra.mxu0 %v3152_v24  ;;  %2838 = vmatprep.mubr.msk.bf16.mxu0 %vm3258_vm4, %v3257_v37 }
 0x333   : > { %2832 = vmatprep.subr.bf16.mxu0 %v3257_v37 }
 0x336   : > { %2833 = vmatpush3.bf16.msra.mxu0 %v3153_v26 }
 0x337   : > { %2834 = vmatprep.subr.bf16.mxu0 %v3257_v37 }
 0x33a   : > { %2835 = vmatpush3.bf16.msra.mxu0 %v3154_v27 }
 0x33b   : > { %2836 = vmatprep.subr.bf16.mxu0 %v3257_v37  ;;  %v2309_v37 = vld [vmem:[%s4005_s8] sm:$0x1] }
 0x33e   : > { %2837 = vmatpush3.bf16.msra.mxu0 %v3155_v28 }
 0x3f1   : > { %v2797_v29 = vpop.f32.mrf.mxu0  ;;  %v2819_v30 = vpop.f32.mrf.mxu1 }
 0x3f3   : > { %v2798_v31 = vpop.f32.mrf.mxu0  ;;  %v2820_v47 = vpop.f32.mrf.mxu1 }
 0x3f4   : > { %v2799_v32 = vadd.f32 %v2798_v31, %v2797_v29  ;;  %v2821_v36 = vadd.f32 %v2820_v47, %v2819_v30 }
 0x3f5   : > { %v2800_v33 = vpop.f32.mrf.mxu0  ;;  %v2822_v34 = vpop.f32.mrf.mxu1 }
 0x3f6   : > { %v2254_v35 = vadd.f32 %v2799_v32, %v2026_v52 }
 0x3f7   : > { %v2801_v38 = vpop.f32.mrf.mxu0  ;;  %v2823_v39 = vpop.f32.mrf.mxu1 }
 0x3f8   : > { %v2294_v40 = vadd.f32 %v2821_v36, %v2254_v35 }
 0x3fa   : > { %v2299_v41 = vmax.f32 %v2294_v40, 0.0 }
 0x3fc   : > { %v2300_v42 = vpack.c.bf16 %v2299_v41, %v2299_v41 }
 0x3fe   : > { %2839 = vmatmul.mubr.msk.bf16.vlgmr.msra.gmra.mxu0 %vm697_vm3, %v2300_v42 }
 0x4be   : > { %v2371_v43 = vpop.f32.mrf.mxu0 }
 0x4bf   : > { %v2372_v44 = vadd.f32 %v2371_v43, %v2309_v37 }
 0x4c0   : > { %v2840_v45 = vpop.f32.mrf.mxu0 }
 0x4c1   : > { %v2378_v46 = vsel %vm2377_vm5, %v2372_v44, -inf }
 0x4c2   : > { %2379 = vmax.xlane.f32.xlu0 %v2378_v46  ;;  %v2374_v48 = vpop.f32.mrf.mxu0 }
 0x4c4   : > { %v2841_v50 = vpop.f32.mrf.mxu0 }
 0x54b   : > { %v2380_v51 = vpop.xlane.xlu0 %2379 }
 0x54c   : > { %v2381_v53 = vsub.f32 %v2372_v44, %v2380_v51 }
 0x54e   : > { %v2382_v56 = vmul.f32 1.442695, %v2381_v53 }
 0x550   : > { %3156 = vpow2.f32 %v2382_v56 }
 0x55d   : > { %v3157_v57 = vpop.eup %3156 }
 0x55e   : > { %v2384_v58 = vsel %vm2377_vm5, %v3157_v57, 0.0 }
 0x55f   : > { %2385 = vadd.xlane.f32.xlu1 %v2384_v58 }
 0x5e8   : > { %v2386_v59 = vpop.xlane.xlu1 %2385 }
 0x5e9   : > { %3158 = vlog2.f32 %v2386_v59 }
 0x5f6   : > { %v3159_v60 = vpop.eup %3158 }
 0x5f7   : > { %v2388_v61 = vmul.f32 0.6931472, %v3159_v60 }
 0x5f9   : > { %v2389_v62 = vsub.f32 %v2381_v53, %v2388_v61 }
 0x5fb   : > { %2390 = vst [vmem:[%s339_s21] sm:$0x1] %v2389_v62 }
 0x5fc   : > { %3199 = shalt.err (!%p3196_p0)
}
 0x5fd   : > { %s3200_s14 = scalar_lea.hbm %s2402_s25, 16  ;;  %s3204_s21 = scalar_lea.hbm %s4006_s9, 32 }
 0x5fe   : > { %p3201_p1 = scmp.ne.s32.totalorder %s2402_s25, %s3200_s14  ;;  %p3205_p4 = scmp.lt.s32.totalorder %s2402_s25, %s4006_s9 }
 0x5ff   : > { %p3206_p7 = scmp.lt.s32.totalorder %s3204_s21, %s3200_s14 }
 0x600   : > { %p3202_p2 = pnand %p3201_p1, %p3348_p5 }
 0x601   : > { %p3207_p6 = por %p3206_p7, %p3205_p4 }
 0x602   : > { %p3203_p3 = pneg %p3202_p2 }
 0x604   : > { %p3208_p8 = pnand %p3207_p6, %p3203_p3 }
 0x606   : > { %3211 = shalt.err (!%p3208_p8)
}
 0x607   : > { %2847 = dma.vmem_to_hbm [thread:$0]  (%p3348_p5), %s2405_s22, 16, %s2402_s25, %s2392_s26  }
 0x608 PF: > { %p2859_p9 = scmp.ge.s32.totalorder %s3250_s12, 2  ;;  %s2416_s27 = sand.u32 1, %s3238_s30  }
 0x609   : > { %p4010_p10 = scmp.ne.s32.totalorder %s4008_s20, 0  ;;  %s2417_s28 = scalar_lea.sflag [#allocation4], %s2416_s27 }
 0x60b   : > { %p2854_p11 = pnand %p2859_p9, %p4010_p10 }
 0x60d   : > { %p2855_p12 = pneg %p2854_p11 }
 0x60f   : > { %3233 = dma.done.wait (%p2855_p12), %s2417_s28, 16  }
 0x610   : > { %3235 = vsyncadd (%p2855_p12), %s2417_s28, 4294967280  ;;  %p20_p13 = scmp.ge.s32.totalorder %s3335_s15, 4   ;;  %s4011_s30 = smov %s3242_s10 }
 0x611   : > { %s4012_s10 = smov %s3246_s11  ;;  %s4013_s11 = smov %s3346_s18 }
 0x612   : > { %s4014_s12 = smov %s3335_s15  ;;  %22 = sbr.rel (!%p20_p13) target bundleno = 4 (0x4), region = 100 }
 0x617   :  { %2421 = vsyncpa [#allocation3], 1 }
 0x618   :  { %2423 = vsyncpa [#allocation3 + $0x1], 1 }
 0x619   :  { %2424 = vsyncpa [#allocation4], 1 }
 0x61a   :  { %2426 = vsyncpa [#allocation4 + $0x1], 1 }

</bundles_post_ra>
